<compile_context>
chip_gen: v5e
topology: v5e:2x2
jax: 0.10.0
libtpu: 0.0.40
codegen_flags: <defaults>
</compile_context>

<pallas_src>
import functools

import jax
import jax.numpy as jnp
from jax.experimental import pallas as pl
from jax.experimental.pallas import tpu as pltpu


def _round_up(v, m):
    return ((v + m - 1) // m) * m


_VMEM_LIMIT = 48 * 1024 * 1024  # well under v7x's 64 MiB physical VMEM
_CONV1_CIN_PAD = 8              # pad conv1 Cin 1 -> 8 so im2col K = 16*8 = 128


# ----------------------------------------------------------------------------
# Kernel 1: tiled  out = act( x @ w + shift )     (BN scale pre-folded into w)
#   grid = (M/tm, N/tn, K/tk), f32 VMEM accumulator, bf16 MXU operands.
# ----------------------------------------------------------------------------
def _matmul_bias_act_kernel(x_ref, w_ref, shift_ref, o_ref, acc_ref, *, act):
    k = pl.program_id(2)

    @pl.when(k == 0)
    def _():
        acc_ref[...] = jnp.zeros_like(acc_ref)

    acc_ref[...] += jnp.dot(x_ref[...], w_ref[...],
                            preferred_element_type=jnp.float32)

    @pl.when(k == pl.num_programs(2) - 1)
    def _():
        y = acc_ref[...] + shift_ref[...]                 # f32 epilogue
        if act == "leaky":
            y = jnp.where(y > 0, y, 0.2 * y)              # LeakyReLU(0.2)
        elif act == "sigmoid":
            y = jax.nn.sigmoid(y)
        o_ref[...] = y.astype(o_ref.dtype)


def fused_matmul_bias_act(x, w, shift, *, act, out_dtype=jnp.bfloat16,
                          bm=512, bn=256, bk=512):
    """act(x @ w + shift).  x:[M,K], w:[K,N], shift:[N].

    Inputs are zero-padded to tile multiples (exact for the matmul; padded N
    columns have shift=0 so they produce exact zeros / 0.5-after-sigmoid that
    are sliced away)."""
    M, K = x.shape
    Kw, N = w.shape
    assert K == Kw

    tm = min(bm, _round_up(M, 8))
    tn = min(bn, _round_up(N, 128))
    tk = K if K <= bk else bk                    # bk is a multiple of 128

    Mp, Np, Kp = _round_up(M, tm), _round_up(N, tn), _round_up(K, tk)

    x = x.astype(jnp.bfloat16)
    w = w.astype(jnp.bfloat16)
    if (Mp, Kp) != (M, K):
        x = jnp.pad(x, ((0, Mp - M), (0, Kp - K)))
    if (Kp, Np) != (K, N):
        w = jnp.pad(w, ((0, Kp - K), (0, Np - N)))
    shift = jnp.pad(shift.astype(jnp.float32), (0, Np - N)).reshape(1, Np)

    grid = (Mp // tm, Np // tn, Kp // tk)
    kernel = functools.partial(_matmul_bias_act_kernel, act=act)
    out = pl.pallas_call(
        kernel,
        out_shape=jax.ShapeDtypeStruct((Mp, Np), out_dtype),
        grid=grid,
        in_specs=[
            pl.BlockSpec((tm, tk), lambda i, j, k: (i, k)),
            pl.BlockSpec((tk, tn), lambda i, j, k: (k, j)),
            pl.BlockSpec((1, tn), lambda i, j, k: (0, j)),
        ],
        out_specs=pl.BlockSpec((tm, tn), lambda i, j, k: (i, j)),
        scratch_shapes=[pltpu.VMEM((tm, tn), jnp.float32)],
        compiler_params=pltpu.CompilerParams(
            dimension_semantics=("parallel", "parallel", "arbitrary"),
            vmem_limit_bytes=_VMEM_LIMIT,
        ),
    )(x, w, shift)
    return out[:M, :N]


# ----------------------------------------------------------------------------
# Kernel 2: fused FC head
#   sigmoid( leaky_relu(x @ w1 + b1, 0.2) @ w2 + b2 )
#   K-tiled grid; the [B, 512] fc1 result stays in a VMEM scratch.
# ----------------------------------------------------------------------------
def _fc_head_kernel(x_ref, w1_ref, b1_ref, w2_ref, b2_ref, o_ref, acc_ref):
    k = pl.program_id(0)

    @pl.when(k == 0)
    def _():
        acc_ref[...] = jnp.zeros_like(acc_ref)

    acc_ref[...] += jnp.dot(x_ref[...], w1_ref[...],
                            preferred_element_type=jnp.float32)

    @pl.when(k == pl.num_programs(0) - 1)
    def _():
        h = acc_ref[...] + b1_ref[...]
        h = jnp.where(h > 0, h, 0.2 * h)           # LeakyReLU(0.2), f32
        # Dropout(0.4): identity in eval mode.
        y = jnp.dot(h.astype(jnp.bfloat16), w2_ref[...],
                    preferred_element_type=jnp.float32)
        y = jax.nn.sigmoid(y + b2_ref[...])
        o_ref[...] = y.astype(o_ref.dtype)


def fc_head(x, w1, b1, w2, b2, *, bk=2048):
    """x:[B,K], w1:[K,H], b1:[H], w2:[H,1], b2:[1] -> [B,1] float32."""
    B, K = x.shape
    H = w1.shape[1]
    NOUT = 128                     # pad fc2 output width to 128 for lane-dense stores
    Bp = _round_up(B, 8)
    tk = K if K <= bk else bk
    Kp = _round_up(K, tk)

    x = x.astype(jnp.bfloat16)
    if (Bp, Kp) != (B, K):
        x = jnp.pad(x, ((0, Bp - B), (0, Kp - K)))
    w1b = w1.astype(jnp.bfloat16)
    if Kp != K:
        w1b = jnp.pad(w1b, ((0, Kp - K), (0, 0)))
    b1 = b1.astype(jnp.float32).reshape(1, H)
    w2b = jnp.pad(w2.astype(jnp.bfloat16), ((0, 0), (0, NOUT - w2.shape[1])))
    b2 = jnp.pad(b2.astype(jnp.float32), (0, NOUT - b2.shape[0])).reshape(1, NOUT)

    nk = Kp // tk
    out = pl.pallas_call(
        _fc_head_kernel,
        out_shape=jax.ShapeDtypeStruct((Bp, NOUT), jnp.float32),
        grid=(nk,),
        in_specs=[
            pl.BlockSpec((Bp, tk), lambda k: (0, k)),
            pl.BlockSpec((tk, H), lambda k: (k, 0)),
            pl.BlockSpec((1, H), lambda k: (0, 0)),
            pl.BlockSpec((H, NOUT), lambda k: (0, 0)),
            pl.BlockSpec((1, NOUT), lambda k: (0, 0)),
        ],
        out_specs=pl.BlockSpec((Bp, NOUT), lambda k: (0, 0)),
        scratch_shapes=[pltpu.VMEM((Bp, H), jnp.float32)],
        compiler_params=pltpu.CompilerParams(
            dimension_semantics=("arbitrary",),
            vmem_limit_bytes=_VMEM_LIMIT,
        ),
    )(x, w1b, b1, w2b, b2)
    return out[:B, :1]


# ----------------------------------------------------------------------------
# Plain-JAX glue: NHWC im2col (K ordered (kh, kw, C), C fastest -> lanes).
# ----------------------------------------------------------------------------
def im2col_nhwc(x, k=4, s=2, p=1):
    N, H, W, C = x.shape
    Ho = (H + 2 * p - k) // s + 1
    Wo = (W + 2 * p - k) // s + 1
    xp = jnp.pad(x, ((0, 0), (p, p), (p, p), (0, 0)))
    taps = []
    for i in range(k):
        for j in range(k):
            taps.append(xp[:, i:i + s * Ho:s, j:j + s * Wo:s, :])
    patches = jnp.stack(taps, axis=3)                   # [N, Ho, Wo, k*k, C]
    patches = patches.reshape(N * Ho * Wo, k * k * C)
    return patches, Ho, Wo


# ----------------------------------------------------------------------------
# Parameters: synthetic PyTorch-layout params + one-time inference prep
# (BN folding into weights, weight flattening/padding, FC pre-transpose).
# ----------------------------------------------------------------------------
def init_params(key, input_size):
    def cos(size):  # conv_output_size(kernel=4, stride=2, padding=1)
        return (size + 2 * 1 - 4) // 2 + 1

    s4 = cos(cos(cos(cos(input_size))))
    final_flat = s4 * s4 * 256

    keys = jax.random.split(key, 16)
    params = {}
    chans = [(1, 32), (32, 64), (64, 128), (128, 256)]
    for li, (cin, cout) in enumerate(chans, start=1):
        kw_, kb, kg, kbt, km = jax.random.split(keys[li], 5)
        params[f"conv{li}_w"] = 0.05 * jax.random.normal(kw_, (cout, cin, 4, 4), jnp.float32)
        params[f"conv{li}_b"] = 0.05 * jax.random.normal(kb, (cout,), jnp.float32)
        params[f"bn{li}_gamma"] = 1.0 + 0.1 * jax.random.normal(kg, (cout,), jnp.float32)
        params[f"bn{li}_beta"] = 0.1 * jax.random.normal(kbt, (cout,), jnp.float32)
        params[f"bn{li}_mean"] = 0.05 * jax.random.normal(km, (cout,), jnp.float32)
        params[f"bn{li}_var"] = jnp.ones((cout,), jnp.float32)

    params["fc1_w"] = 0.02 * jax.random.normal(keys[10], (512, final_flat), jnp.float32)
    params["fc1_b"] = 0.02 * jax.random.normal(keys[11], (512,), jnp.float32)
    params["fc2_w"] = 0.02 * jax.random.normal(keys[12], (1, 512), jnp.float32)
    params["fc2_b"] = 0.02 * jax.random.normal(keys[13], (1,), jnp.float32)
    params["final_flat"] = final_flat
    params["s4"] = s4
    return params


def prepare_inference_params(params, eps=1e-5):
    """One-time prep: fold eval-mode BN (scale into the weights, shift kept),
    flatten conv weights to the NHWC im2col layout with 128-padded output
    channels, pre-transpose/permute FC weights."""
    prep = {}
    cin_pad = _CONV1_CIN_PAD                      # conv1 input padded to 8 ch
    for li in range(1, 5):
        w = params[f"conv{li}_w"]                 # [Cout, Cin, 4, 4] (PyTorch)
        b = params[f"conv{li}_b"]
        gamma, beta = params[f"bn{li}_gamma"], params[f"bn{li}_beta"]
        mean, var = params[f"bn{li}_mean"], params[f"bn{li}_var"]
        cout, cin, kh, kw = w.shape
        cout_pad = _round_up(cout, 128)

        if cin_pad > cin:                         # match zero-padded input channels
            w = jnp.pad(w, ((0, 0), (0, cin_pad - cin), (0, 0), (0, 0)))

        inv_std = 1.0 / jnp.sqrt(var + eps)       # fold eval-mode BN + conv bias
        scale = gamma * inv_std
        shift = (b - mean) * scale + beta

        w = jnp.pad(w, ((0, cout_pad - cout), (0, 0), (0, 0), (0, 0)))
        scale = jnp.pad(scale, (0, cout_pad - cout))   # padded channels -> exact 0
        shift = jnp.pad(shift, (0, cout_pad - cout))

        # [kh, kw, Cin_pad, Cout_pad] flattened to match NHWC im2col K ordering;
        # BN scale folded into the weight columns (f32) before the bf16 cast.
        w_flat = w.transpose(2, 3, 1, 0).reshape(kh * kw * cin_pad, cout_pad)
        w_flat = w_flat * scale[None, :]
        prep[f"conv{li}_wflat"] = w_flat.astype(jnp.bfloat16)
        prep[f"conv{li}_shift"] = shift
        cin_pad = cout_pad

    s4 = params["s4"]
    flat = params["final_flat"]
    # PyTorch fc1.weight is [512, flat] with flat ordered (c, h, w); permute to
    # our NHWC flatten (h, w, c) and pre-transpose to [flat, 512] — done once.
    w1 = params["fc1_w"].reshape(512, 256, s4, s4).transpose(0, 2, 3, 1).reshape(512, flat)
    prep["fc1_wt"] = w1.T.astype(jnp.bfloat16)            # [flat, 512]
    prep["fc1_b"] = params["fc1_b"]
    prep["fc2_wt"] = params["fc2_w"].T.astype(jnp.bfloat16)  # [512, 1]
    prep["fc2_b"] = params["fc2_b"]
    return prep


# ----------------------------------------------------------------------------
# Forward pass (NHWC end-to-end; single NCHW->NHWC transpose at the input).
# ----------------------------------------------------------------------------
def highres_discriminator_forward(prep, x_nchw):
    x = x_nchw.transpose(0, 2, 3, 1).astype(jnp.bfloat16)   # [N, H, W, 1]
    n = x.shape[0]
    # Pad conv1 input channels 1 -> 8 so its im2col K axis is exactly 128.
    x = jnp.pad(x, ((0, 0), (0, 0), (0, 0), (0, _CONV1_CIN_PAD - x.shape[-1])))
    for li in range(1, 5):
        patches, Ho, Wo = im2col_nhwc(x)
        cout_pad = prep[f"conv{li}_wflat"].shape[1]
        y = fused_matmul_bias_act(
            patches, prep[f"conv{li}_wflat"], prep[f"conv{li}_shift"],
            act="leaky", out_dtype=jnp.bfloat16)
        x = y.reshape(n, Ho, Wo, cout_pad)

    flat = x.reshape(n, -1)                 # [N, s4*s4*256] (NHWC flatten)
    out = fc_head(flat, prep["fc1_wt"], prep["fc1_b"],
                  prep["fc2_wt"], prep["fc2_b"])
    return out                              # [N, 1] float32 in (0, 1)


if __name__ == "__main__":
    INPUT_SIZE = 16   # 16 -> 8 -> 4 -> 2 -> 1, final_flat = 256 (small demo)
    BATCH = 2

    key = jax.random.PRNGKey(0)
    pkey, xkey = jax.random.split(key)
    raw_params = init_params(pkey, INPUT_SIZE)
    prep = prepare_inference_params(raw_params)
    x = jax.random.normal(xkey, (BATCH, 1, INPUT_SIZE, INPUT_SIZE), jnp.float32)

    forward = jax.jit(highres_discriminator_forward)
    out = forward(prep, x)
    out = jax.block_until_ready(out)

    assert out.shape == (BATCH, 1), out.shape
    assert bool(jnp.all(jnp.isfinite(out)))
    assert bool(jnp.all((out >= 0.0) & (out <= 1.0)))
    print("KERNEL_OK")
</pallas_src>

<mosaic_0001>
module attributes {stable_mosaic.version = 11 : i64} {
  func.func @_matmul_bias_act_kernel(%arg0: i32, %arg1: i32, %arg2: i32, %arg3: memref<128x128xbf16, #tpu.memory_space<vmem>>, %arg4: memref<128x128xbf16, #tpu.memory_space<vmem>>, %arg5: memref<1x128xf32, #tpu.memory_space<vmem>>, %arg6: memref<128x128xbf16, #tpu.memory_space<vmem>>, %arg7: memref<128x128xf32, #tpu.memory_space<vmem>>) attributes {dimension_semantics = [#tpu.dimension_semantics<parallel>, #tpu.dimension_semantics<parallel>, #tpu.dimension_semantics<arbitrary>], iteration_bounds = array<i64: 1, 1, 1>, scalar_prefetch = 0 : i64, scratch_operands = 1 : i64, tpu.core_type = #tpu.core_type<tc>, window_params = [{transform_indices = @transform_0, window_bounds = array<i64: 128, 128>}, {transform_indices = @transform_1, window_bounds = array<i64: 128, 128>}, {transform_indices = @transform_2, window_bounds = array<i64: 1, 128>}, {transform_indices = @transform_3, window_bounds = array<i64: 128, 128>}]} {
    %c0_i32 = arith.constant 0 : i32
    %0 = arith.cmpi eq, %arg2, %c0_i32 : i32
    %1 = arith.extui %0 : i1 to i32
    %c0_i32_0 = arith.constant 0 : i32
    %2 = arith.cmpi ne, %1, %c0_i32_0 : i32
    scf.if %2 {
      %cst_10 = arith.constant 0.000000e+00 : f32
      %12 = vector.broadcast %cst_10 : f32 to vector<128x128xf32>
      %c0_11 = arith.constant 0 : index
      %c0_12 = arith.constant 0 : index
      %13 = vector.load %arg7[%c0_11, %c0_12] : memref<128x128xf32, #tpu.memory_space<vmem>>, vector<128x128xf32>
      tpu.vector_store %arg7[%c0_11, %c0_12], %12 {strides = array<i32>} : memref<128x128xf32, #tpu.memory_space<vmem>>, vector<128x128xf32>,
    } else {
    }
    %c0 = arith.constant 0 : index
    %c0_1 = arith.constant 0 : index
    %3 = vector.load %arg7[%c0, %c0_1] : memref<128x128xf32, #tpu.memory_space<vmem>>, vector<128x128xf32>
    %c0_2 = arith.constant 0 : index
    %c0_3 = arith.constant 0 : index
    %4 = vector.load %arg3[%c0_2, %c0_3] : memref<128x128xbf16, #tpu.memory_space<vmem>>, vector<128x128xbf16>
    %c0_4 = arith.constant 0 : index
    %c0_5 = arith.constant 0 : index
    %5 = vector.load %arg4[%c0_4, %c0_5] : memref<128x128xbf16, #tpu.memory_space<vmem>>, vector<128x128xbf16>
    %cst = arith.constant dense<0.000000e+00> : vector<128x128xf32>
    %6 = tpu.matmul %4, %5, %cst {dimension_numbers = #tpu.dot_dimension_numbers<[1], [0], [0], [1], [0, 0, 1, 1], [], []>} : vector<128x128xbf16>, vector<128x128xbf16>, vector<128x128xf32> -> vector<128x128xf32>
    %7 = arith.addf %3, %6 : vector<128x128xf32>
    %c0_6 = arith.constant 0 : index
    %c0_7 = arith.constant 0 : index
    %8 = vector.load %arg7[%c0_6, %c0_7] : memref<128x128xf32, #tpu.memory_space<vmem>>, vector<128x128xf32>
    tpu.vector_store %arg7[%c0_6, %c0_7], %7 {strides = array<i32>} : memref<128x128xf32, #tpu.memory_space<vmem>>, vector<128x128xf32>,
    %c0_i32_8 = arith.constant 0 : i32
    %9 = arith.cmpi eq, %arg2, %c0_i32_8 : i32
    %10 = arith.extui %9 : i1 to i32
    %c0_i32_9 = arith.constant 0 : i32
    %11 = arith.cmpi ne, %10, %c0_i32_9 : i32
    scf.if %11 {
      %c0_10 = arith.constant 0 : index
      %c0_11 = arith.constant 0 : index
      %12 = vector.load %arg7[%c0_10, %c0_11] : memref<128x128xf32, #tpu.memory_space<vmem>>, vector<128x128xf32>
      %c0_12 = arith.constant 0 : index
      %c0_13 = arith.constant 0 : index
      %13 = vector.load %arg5[%c0_12, %c0_13] : memref<1x128xf32, #tpu.memory_space<vmem>>, vector<1x128xf32>
      %14 = vector.broadcast %13 : vector<1x128xf32> to vector<128x128xf32>
      %15 = arith.addf %12, %14 : vector<128x128xf32>
      %cst_14 = arith.constant 0.000000e+00 : f32
      %16 = vector.broadcast %cst_14 : f32 to vector<128x128xf32>
      %17 = arith.cmpf ogt, %15, %16 : vector<128x128xf32>
      %cst_15 = arith.constant 2.000000e-01 : f32
      %18 = vector.broadcast %cst_15 : f32 to vector<128x128xf32>
      %19 = arith.mulf %18, %15 : vector<128x128xf32>
      %20 = arith.select %17, %15, %19 : vector<128x128xi1>, vector<128x128xf32>
      %21 = arith.truncf %20 : vector<128x128xf32> to vector<128x128xbf16>
      %c0_16 = arith.constant 0 : index
      %c0_17 = arith.constant 0 : index
      %22 = vector.load %arg6[%c0_16, %c0_17] : memref<128x128xbf16, #tpu.memory_space<vmem>>, vector<128x128xbf16>
      tpu.vector_store %arg6[%c0_16, %c0_17], %21 {strides = array<i32>} : memref<128x128xbf16, #tpu.memory_space<vmem>>, vector<128x128xbf16>,
    } else {
    }
    return
  }
  func.func @transform_0(%arg0: i32, %arg1: i32, %arg2: i32) -> (i32, i32) {
    %c0_i32 = arith.constant 0 : i32
    return %arg0, %arg2 : i32, i32
  }
  func.func @transform_1(%arg0: i32, %arg1: i32, %arg2: i32) -> (i32, i32) {
    %c0_i32 = arith.constant 0 : i32
    return %arg2, %arg1 : i32, i32
  }
  func.func @transform_2(%arg0: i32, %arg1: i32, %arg2: i32) -> (i32, i32) {
    %c0_i32 = arith.constant 0 : i32
    %c0_i32_0 = arith.constant 0 : i32
    return %c0_i32, %arg1 : i32, i32
  }
  func.func @transform_3(%arg0: i32, %arg1: i32, %arg2: i32) -> (i32, i32) {
    %c0_i32 = arith.constant 0 : i32
    return %arg0, %arg1 : i32, i32
  }
}

module attributes {stable_mosaic.version = 11 : i64} {
  func.func @_matmul_bias_act_kernel(%arg0: i32, %arg1: i32, %arg2: i32, %arg3: memref<32x512xbf16, #tpu.memory_space<vmem>>, %arg4: memref<512x128xbf16, #tpu.memory_space<vmem>>, %arg5: memref<1x128xf32, #tpu.memory_space<vmem>>, %arg6: memref<32x128xbf16, #tpu.memory_space<vmem>>, %arg7: memref<32x128xf32, #tpu.memory_space<vmem>>) attributes {dimension_semantics = [#tpu.dimension_semantics<parallel>, #tpu.dimension_semantics<parallel>, #tpu.dimension_semantics<arbitrary>], iteration_bounds = array<i64: 1, 1, 4>, scalar_prefetch = 0 : i64, scratch_operands = 1 : i64, tpu.core_type = #tpu.core_type<tc>, window_params = [{transform_indices = @transform_0, window_bounds = array<i64: 32, 512>}, {transform_indices = @transform_1, window_bounds = array<i64: 512, 128>}, {transform_indices = @transform_2, window_bounds = array<i64: 1, 128>}, {transform_indices = @transform_3, window_bounds = array<i64: 32, 128>}]} {
    %c0_i32 = arith.constant 0 : i32
    %0 = arith.cmpi eq, %arg2, %c0_i32 : i32
    %1 = arith.extui %0 : i1 to i32
    %c0_i32_0 = arith.constant 0 : i32
    %2 = arith.cmpi ne, %1, %c0_i32_0 : i32
    scf.if %2 {
      %cst_9 = arith.constant 0.000000e+00 : f32
      %12 = vector.broadcast %cst_9 : f32 to vector<32x128xf32>
      %c0_10 = arith.constant 0 : index
      %c0_11 = arith.constant 0 : index
      %13 = vector.load %arg7[%c0_10, %c0_11] : memref<32x128xf32, #tpu.memory_space<vmem>>, vector<32x128xf32>
      tpu.vector_store %arg7[%c0_10, %c0_11], %12 {strides = array<i32>} : memref<32x128xf32, #tpu.memory_space<vmem>>, vector<32x128xf32>,
    } else {
    }
    %c0 = arith.constant 0 : index
    %c0_1 = arith.constant 0 : index
    %3 = vector.load %arg7[%c0, %c0_1] : memref<32x128xf32, #tpu.memory_space<vmem>>, vector<32x128xf32>
    %c0_2 = arith.constant 0 : index
    %c0_3 = arith.constant 0 : index
    %4 = vector.load %arg3[%c0_2, %c0_3] : memref<32x512xbf16, #tpu.memory_space<vmem>>, vector<32x512xbf16>
    %c0_4 = arith.constant 0 : index
    %c0_5 = arith.constant 0 : index
    %5 = vector.load %arg4[%c0_4, %c0_5] : memref<512x128xbf16, #tpu.memory_space<vmem>>, vector<512x128xbf16>
    %cst = arith.constant dense<0.000000e+00> : vector<32x128xf32>
    %6 = tpu.matmul %4, %5, %cst {dimension_numbers = #tpu.dot_dimension_numbers<[1], [0], [0], [1], [0, 0, 1, 1], [], []>} : vector<32x512xbf16>, vector<512x128xbf16>, vector<32x128xf32> -> vector<32x128xf32>
    %7 = arith.addf %3, %6 : vector<32x128xf32>
    %c0_6 = arith.constant 0 : index
    %c0_7 = arith.constant 0 : index
    %8 = vector.load %arg7[%c0_6, %c0_7] : memref<32x128xf32, #tpu.memory_space<vmem>>, vector<32x128xf32>
    tpu.vector_store %arg7[%c0_6, %c0_7], %7 {strides = array<i32>} : memref<32x128xf32, #tpu.memory_space<vmem>>, vector<32x128xf32>,
    %c3_i32 = arith.constant 3 : i32
    %9 = arith.cmpi eq, %arg2, %c3_i32 : i32
    %10 = arith.extui %9 : i1 to i32
    %c0_i32_8 = arith.constant 0 : i32
    %11 = arith.cmpi ne, %10, %c0_i32_8 : i32
    scf.if %11 {
      %c0_9 = arith.constant 0 : index
      %c0_10 = arith.constant 0 : index
      %12 = vector.load %arg7[%c0_9, %c0_10] : memref<32x128xf32, #tpu.memory_space<vmem>>, vector<32x128xf32>
      %c0_11 = arith.constant 0 : index
      %c0_12 = arith.constant 0 : index
      %13 = vector.load %arg5[%c0_11, %c0_12] : memref<1x128xf32, #tpu.memory_space<vmem>>, vector<1x128xf32>
      %14 = vector.broadcast %13 : vector<1x128xf32> to vector<32x128xf32>
      %15 = arith.addf %12, %14 : vector<32x128xf32>
      %cst_13 = arith.constant 0.000000e+00 : f32
      %16 = vector.broadcast %cst_13 : f32 to vector<32x128xf32>
      %17 = arith.cmpf ogt, %15, %16 : vector<32x128xf32>
      %cst_14 = arith.constant 2.000000e-01 : f32
      %18 = vector.broadcast %cst_14 : f32 to vector<32x128xf32>
      %19 = arith.mulf %18, %15 : vector<32x128xf32>
      %20 = arith.select %17, %15, %19 : vector<32x128xi1>, vector<32x128xf32>
      %21 = arith.truncf %20 : vector<32x128xf32> to vector<32x128xbf16>
      %c0_15 = arith.constant 0 : index
      %c0_16 = arith.constant 0 : index
      %22 = vector.load %arg6[%c0_15, %c0_16] : memref<32x128xbf16, #tpu.memory_space<vmem>>, vector<32x128xbf16>
      tpu.vector_store %arg6[%c0_15, %c0_16], %21 {strides = array<i32>} : memref<32x128xbf16, #tpu.memory_space<vmem>>, vector<32x128xbf16>,
    } else {
    }
    return
  }
  func.func @transform_0(%arg0: i32, %arg1: i32, %arg2: i32) -> (i32, i32) {
    %c0_i32 = arith.constant 0 : i32
    return %arg0, %arg2 : i32, i32
  }
  func.func @transform_1(%arg0: i32, %arg1: i32, %arg2: i32) -> (i32, i32) {
    %c0_i32 = arith.constant 0 : i32
    return %arg2, %arg1 : i32, i32
  }
  func.func @transform_2(%arg0: i32, %arg1: i32, %arg2: i32) -> (i32, i32) {
    %c0_i32 = arith.constant 0 : i32
    %c0_i32_0 = arith.constant 0 : i32
    return %c0_i32, %arg1 : i32, i32
  }
  func.func @transform_3(%arg0: i32, %arg1: i32, %arg2: i32) -> (i32, i32) {
    %c0_i32 = arith.constant 0 : i32
    return %arg0, %arg1 : i32, i32
  }
}

module attributes {stable_mosaic.version = 11 : i64} {
  func.func @_matmul_bias_act_kernel(%arg0: i32, %arg1: i32, %arg2: i32, %arg3: memref<8x512xbf16, #tpu.memory_space<vmem>>, %arg4: memref<512x128xbf16, #tpu.memory_space<vmem>>, %arg5: memref<1x128xf32, #tpu.memory_space<vmem>>, %arg6: memref<8x128xbf16, #tpu.memory_space<vmem>>, %arg7: memref<8x128xf32, #tpu.memory_space<vmem>>) attributes {dimension_semantics = [#tpu.dimension_semantics<parallel>, #tpu.dimension_semantics<parallel>, #tpu.dimension_semantics<arbitrary>], iteration_bounds = array<i64: 1, 1, 4>, scalar_prefetch = 0 : i64, scratch_operands = 1 : i64, tpu.core_type = #tpu.core_type<tc>, window_params = [{transform_indices = @transform_0, window_bounds = array<i64: 8, 512>}, {transform_indices = @transform_1, window_bounds = array<i64: 512, 128>}, {transform_indices = @transform_2, window_bounds = array<i64: 1, 128>}, {transform_indices = @transform_3, window_bounds = array<i64: 8, 128>}]} {
    %c0_i32 = arith.constant 0 : i32
    %0 = arith.cmpi eq, %arg2, %c0_i32 : i32
    %1 = arith.extui %0 : i1 to i32
    %c0_i32_0 = arith.constant 0 : i32
    %2 = arith.cmpi ne, %1, %c0_i32_0 : i32
    scf.if %2 {
      %cst_9 = arith.constant 0.000000e+00 : f32
      %12 = vector.broadcast %cst_9 : f32 to vector<8x128xf32>
      %c0_10 = arith.constant 0 : index
      %c0_11 = arith.constant 0 : index
      %13 = vector.load %arg7[%c0_10, %c0_11] : memref<8x128xf32, #tpu.memory_space<vmem>>, vector<8x128xf32>
      tpu.vector_store %arg7[%c0_10, %c0_11], %12 {strides = array<i32>} : memref<8x128xf32, #tpu.memory_space<vmem>>, vector<8x128xf32>,
    } else {
    }
    %c0 = arith.constant 0 : index
    %c0_1 = arith.constant 0 : index
    %3 = vector.load %arg7[%c0, %c0_1] : memref<8x128xf32, #tpu.memory_space<vmem>>, vector<8x128xf32>
    %c0_2 = arith.constant 0 : index
    %c0_3 = arith.constant 0 : index
    %4 = vector.load %arg3[%c0_2, %c0_3] : memref<8x512xbf16, #tpu.memory_space<vmem>>, vector<8x512xbf16>
    %c0_4 = arith.constant 0 : index
    %c0_5 = arith.constant 0 : index
    %5 = vector.load %arg4[%c0_4, %c0_5] : memref<512x128xbf16, #tpu.memory_space<vmem>>, vector<512x128xbf16>
    %cst = arith.constant dense<0.000000e+00> : vector<8x128xf32>
    %6 = tpu.matmul %4, %5, %cst {dimension_numbers = #tpu.dot_dimension_numbers<[1], [0], [0], [1], [0, 0, 1, 1], [], []>} : vector<8x512xbf16>, vector<512x128xbf16>, vector<8x128xf32> -> vector<8x128xf32>
    %7 = arith.addf %3, %6 : vector<8x128xf32>
    %c0_6 = arith.constant 0 : index
    %c0_7 = arith.constant 0 : index
    %8 = vector.load %arg7[%c0_6, %c0_7] : memref<8x128xf32, #tpu.memory_space<vmem>>, vector<8x128xf32>
    tpu.vector_store %arg7[%c0_6, %c0_7], %7 {strides = array<i32>} : memref<8x128xf32, #tpu.memory_space<vmem>>, vector<8x128xf32>,
    %c3_i32 = arith.constant 3 : i32
    %9 = arith.cmpi eq, %arg2, %c3_i32 : i32
    %10 = arith.extui %9 : i1 to i32
    %c0_i32_8 = arith.constant 0 : i32
    %11 = arith.cmpi ne, %10, %c0_i32_8 : i32
    scf.if %11 {
      %c0_9 = arith.constant 0 : index
      %c0_10 = arith.constant 0 : index
      %12 = vector.load %arg7[%c0_9, %c0_10] : memref<8x128xf32, #tpu.memory_space<vmem>>, vector<8x128xf32>
      %c0_11 = arith.constant 0 : index
      %c0_12 = arith.constant 0 : index
      %13 = vector.load %arg5[%c0_11, %c0_12] : memref<1x128xf32, #tpu.memory_space<vmem>>, vector<1x128xf32>
      %14 = vector.broadcast %13 : vector<1x128xf32> to vector<8x128xf32>
      %15 = arith.addf %12, %14 : vector<8x128xf32>
      %cst_13 = arith.constant 0.000000e+00 : f32
      %16 = vector.broadcast %cst_13 : f32 to vector<8x128xf32>
      %17 = arith.cmpf ogt, %15, %16 : vector<8x128xf32>
      %cst_14 = arith.constant 2.000000e-01 : f32
      %18 = vector.broadcast %cst_14 : f32 to vector<8x128xf32>
      %19 = arith.mulf %18, %15 : vector<8x128xf32>
      %20 = arith.select %17, %15, %19 : vector<8x128xi1>, vector<8x128xf32>
      %21 = arith.truncf %20 : vector<8x128xf32> to vector<8x128xbf16>
      %c0_15 = arith.constant 0 : index
      %c0_16 = arith.constant 0 : index
      %22 = vector.load %arg6[%c0_15, %c0_16] : memref<8x128xbf16, #tpu.memory_space<vmem>>, vector<8x128xbf16>
      tpu.vector_store %arg6[%c0_15, %c0_16], %21 {strides = array<i32>} : memref<8x128xbf16, #tpu.memory_space<vmem>>, vector<8x128xbf16>,
    } else {
    }
    return
  }
  func.func @transform_0(%arg0: i32, %arg1: i32, %arg2: i32) -> (i32, i32) {
    %c0_i32 = arith.constant 0 : i32
    return %arg0, %arg2 : i32, i32
  }
  func.func @transform_1(%arg0: i32, %arg1: i32, %arg2: i32) -> (i32, i32) {
    %c0_i32 = arith.constant 0 : i32
    return %arg2, %arg1 : i32, i32
  }
  func.func @transform_2(%arg0: i32, %arg1: i32, %arg2: i32) -> (i32, i32) {
    %c0_i32 = arith.constant 0 : i32
    %c0_i32_0 = arith.constant 0 : i32
    return %c0_i32, %arg1 : i32, i32
  }
  func.func @transform_3(%arg0: i32, %arg1: i32, %arg2: i32) -> (i32, i32) {
    %c0_i32 = arith.constant 0 : i32
    return %arg0, %arg1 : i32, i32
  }
}

module attributes {stable_mosaic.version = 11 : i64} {
  func.func @_matmul_bias_act_kernel(%arg0: i32, %arg1: i32, %arg2: i32, %arg3: memref<8x512xbf16, #tpu.memory_space<vmem>>, %arg4: memref<512x256xbf16, #tpu.memory_space<vmem>>, %arg5: memref<1x256xf32, #tpu.memory_space<vmem>>, %arg6: memref<8x256xbf16, #tpu.memory_space<vmem>>, %arg7: memref<8x256xf32, #tpu.memory_space<vmem>>) attributes {dimension_semantics = [#tpu.dimension_semantics<parallel>, #tpu.dimension_semantics<parallel>, #tpu.dimension_semantics<arbitrary>], iteration_bounds = array<i64: 1, 1, 4>, scalar_prefetch = 0 : i64, scratch_operands = 1 : i64, tpu.core_type = #tpu.core_type<tc>, window_params = [{transform_indices = @transform_0, window_bounds = array<i64: 8, 512>}, {transform_indices = @transform_1, window_bounds = array<i64: 512, 256>}, {transform_indices = @transform_2, window_bounds = array<i64: 1, 256>}, {transform_indices = @transform_3, window_bounds = array<i64: 8, 256>}]} {
    %c0_i32 = arith.constant 0 : i32
    %0 = arith.cmpi eq, %arg2, %c0_i32 : i32
    %1 = arith.extui %0 : i1 to i32
    %c0_i32_0 = arith.constant 0 : i32
    %2 = arith.cmpi ne, %1, %c0_i32_0 : i32
    scf.if %2 {
      %cst_9 = arith.constant 0.000000e+00 : f32
      %12 = vector.broadcast %cst_9 : f32 to vector<8x256xf32>
      %c0_10 = arith.constant 0 : index
      %c0_11 = arith.constant 0 : index
      %13 = vector.load %arg7[%c0_10, %c0_11] : memref<8x256xf32, #tpu.memory_space<vmem>>, vector<8x256xf32>
      tpu.vector_store %arg7[%c0_10, %c0_11], %12 {strides = array<i32>} : memref<8x256xf32, #tpu.memory_space<vmem>>, vector<8x256xf32>,
    } else {
    }
    %c0 = arith.constant 0 : index
    %c0_1 = arith.constant 0 : index
    %3 = vector.load %arg7[%c0, %c0_1] : memref<8x256xf32, #tpu.memory_space<vmem>>, vector<8x256xf32>
    %c0_2 = arith.constant 0 : index
    %c0_3 = arith.constant 0 : index
    %4 = vector.load %arg3[%c0_2, %c0_3] : memref<8x512xbf16, #tpu.memory_space<vmem>>, vector<8x512xbf16>
    %c0_4 = arith.constant 0 : index
    %c0_5 = arith.constant 0 : index
    %5 = vector.load %arg4[%c0_4, %c0_5] : memref<512x256xbf16, #tpu.memory_space<vmem>>, vector<512x256xbf16>
    %cst = arith.constant dense<0.000000e+00> : vector<8x256xf32>
    %6 = tpu.matmul %4, %5, %cst {dimension_numbers = #tpu.dot_dimension_numbers<[1], [0], [0], [1], [0, 0, 1, 1], [], []>} : vector<8x512xbf16>, vector<512x256xbf16>, vector<8x256xf32> -> vector<8x256xf32>
    %7 = arith.addf %3, %6 : vector<8x256xf32>
    %c0_6 = arith.constant 0 : index
    %c0_7 = arith.constant 0 : index
    %8 = vector.load %arg7[%c0_6, %c0_7] : memref<8x256xf32, #tpu.memory_space<vmem>>, vector<8x256xf32>
    tpu.vector_store %arg7[%c0_6, %c0_7], %7 {strides = array<i32>} : memref<8x256xf32, #tpu.memory_space<vmem>>, vector<8x256xf32>,
    %c3_i32 = arith.constant 3 : i32
    %9 = arith.cmpi eq, %arg2, %c3_i32 : i32
    %10 = arith.extui %9 : i1 to i32
    %c0_i32_8 = arith.constant 0 : i32
    %11 = arith.cmpi ne, %10, %c0_i32_8 : i32
    scf.if %11 {
      %c0_9 = arith.constant 0 : index
      %c0_10 = arith.constant 0 : index
      %12 = vector.load %arg7[%c0_9, %c0_10] : memref<8x256xf32, #tpu.memory_space<vmem>>, vector<8x256xf32>
      %c0_11 = arith.constant 0 : index
      %c0_12 = arith.constant 0 : index
      %13 = vector.load %arg5[%c0_11, %c0_12] : memref<1x256xf32, #tpu.memory_space<vmem>>, vector<1x256xf32>
      %14 = vector.broadcast %13 : vector<1x256xf32> to vector<8x256xf32>
      %15 = arith.addf %12, %14 : vector<8x256xf32>
      %cst_13 = arith.constant 0.000000e+00 : f32
      %16 = vector.broadcast %cst_13 : f32 to vector<8x256xf32>
      %17 = arith.cmpf ogt, %15, %16 : vector<8x256xf32>
      %cst_14 = arith.constant 2.000000e-01 : f32
      %18 = vector.broadcast %cst_14 : f32 to vector<8x256xf32>
      %19 = arith.mulf %18, %15 : vector<8x256xf32>
      %20 = arith.select %17, %15, %19 : vector<8x256xi1>, vector<8x256xf32>
      %21 = arith.truncf %20 : vector<8x256xf32> to vector<8x256xbf16>
      %c0_15 = arith.constant 0 : index
      %c0_16 = arith.constant 0 : index
      %22 = vector.load %arg6[%c0_15, %c0_16] : memref<8x256xbf16, #tpu.memory_space<vmem>>, vector<8x256xbf16>
      tpu.vector_store %arg6[%c0_15, %c0_16], %21 {strides = array<i32>} : memref<8x256xbf16, #tpu.memory_space<vmem>>, vector<8x256xbf16>,
    } else {
    }
    return
  }
  func.func @transform_0(%arg0: i32, %arg1: i32, %arg2: i32) -> (i32, i32) {
    %c0_i32 = arith.constant 0 : i32
    return %arg0, %arg2 : i32, i32
  }
  func.func @transform_1(%arg0: i32, %arg1: i32, %arg2: i32) -> (i32, i32) {
    %c0_i32 = arith.constant 0 : i32
    return %arg2, %arg1 : i32, i32
  }
  func.func @transform_2(%arg0: i32, %arg1: i32, %arg2: i32) -> (i32, i32) {
    %c0_i32 = arith.constant 0 : i32
    %c0_i32_0 = arith.constant 0 : i32
    return %c0_i32, %arg1 : i32, i32
  }
  func.func @transform_3(%arg0: i32, %arg1: i32, %arg2: i32) -> (i32, i32) {
    %c0_i32 = arith.constant 0 : i32
    return %arg0, %arg1 : i32, i32
  }
}

module attributes {stable_mosaic.version = 11 : i64} {
  func.func @_fc_head_kernel(%arg0: i32, %arg1: memref<8x256xbf16, #tpu.memory_space<vmem>>, %arg2: memref<256x512xbf16, #tpu.memory_space<vmem>>, %arg3: memref<1x512xf32, #tpu.memory_space<vmem>>, %arg4: memref<512x128xbf16, #tpu.memory_space<vmem>>, %arg5: memref<1x128xf32, #tpu.memory_space<vmem>>, %arg6: memref<8x128xf32, #tpu.memory_space<vmem>>, %arg7: memref<8x512xf32, #tpu.memory_space<vmem>>) attributes {dimension_semantics = [#tpu.dimension_semantics<arbitrary>], iteration_bounds = array<i64: 1>, scalar_prefetch = 0 : i64, scratch_operands = 1 : i64, tpu.core_type = #tpu.core_type<tc>, window_params = [{transform_indices = @transform_0, window_bounds = array<i64: 8, 256>}, {transform_indices = @transform_1, window_bounds = array<i64: 256, 512>}, {pipeline_mode = #tpu.pipeline_mode<synchronous>, transform_indices = @transform_2, window_bounds = array<i64: 1, 512>}, {pipeline_mode = #tpu.pipeline_mode<synchronous>, transform_indices = @transform_3, window_bounds = array<i64: 512, 128>}, {pipeline_mode = #tpu.pipeline_mode<synchronous>, transform_indices = @transform_4, window_bounds = array<i64: 1, 128>}, {pipeline_mode = #tpu.pipeline_mode<synchronous>, transform_indices = @transform_5, window_bounds = array<i64: 8, 128>}]} {
    %c0_i32 = arith.constant 0 : i32
    %0 = arith.cmpi eq, %arg0, %c0_i32 : i32
    %1 = arith.extui %0 : i1 to i32
    %c0_i32_0 = arith.constant 0 : i32
    %2 = arith.cmpi ne, %1, %c0_i32_0 : i32
    scf.if %2 {
      %cst_10 = arith.constant 0.000000e+00 : f32
      %12 = vector.broadcast %cst_10 : f32 to vector<8x512xf32>
      %c0_11 = arith.constant 0 : index
      %c0_12 = arith.constant 0 : index
      %13 = vector.load %arg7[%c0_11, %c0_12] : memref<8x512xf32, #tpu.memory_space<vmem>>, vector<8x512xf32>
      tpu.vector_store %arg7[%c0_11, %c0_12], %12 {strides = array<i32>} : memref<8x512xf32, #tpu.memory_space<vmem>>, vector<8x512xf32>,
    } else {
    }
    %c0 = arith.constant 0 : index
    %c0_1 = arith.constant 0 : index
    %3 = vector.load %arg7[%c0, %c0_1] : memref<8x512xf32, #tpu.memory_space<vmem>>, vector<8x512xf32>
    %c0_2 = arith.constant 0 : index
    %c0_3 = arith.constant 0 : index
    %4 = vector.load %arg1[%c0_2, %c0_3] : memref<8x256xbf16, #tpu.memory_space<vmem>>, vector<8x256xbf16>
    %c0_4 = arith.constant 0 : index
    %c0_5 = arith.constant 0 : index
    %5 = vector.load %arg2[%c0_4, %c0_5] : memref<256x512xbf16, #tpu.memory_space<vmem>>, vector<256x512xbf16>
    %cst = arith.constant dense<0.000000e+00> : vector<8x512xf32>
    %6 = tpu.matmul %4, %5, %cst {dimension_numbers = #tpu.dot_dimension_numbers<[1], [0], [0], [1], [0, 0, 1, 1], [], []>} : vector<8x256xbf16>, vector<256x512xbf16>, vector<8x512xf32> -> vector<8x512xf32>
    %7 = arith.addf %3, %6 : vector<8x512xf32>
    %c0_6 = arith.constant 0 : index
    %c0_7 = arith.constant 0 : index
    %8 = vector.load %arg7[%c0_6, %c0_7] : memref<8x512xf32, #tpu.memory_space<vmem>>, vector<8x512xf32>
    tpu.vector_store %arg7[%c0_6, %c0_7], %7 {strides = array<i32>} : memref<8x512xf32, #tpu.memory_space<vmem>>, vector<8x512xf32>,
    %c0_i32_8 = arith.constant 0 : i32
    %9 = arith.cmpi eq, %arg0, %c0_i32_8 : i32
    %10 = arith.extui %9 : i1 to i32
    %c0_i32_9 = arith.constant 0 : i32
    %11 = arith.cmpi ne, %10, %c0_i32_9 : i32
    scf.if %11 {
      %c0_10 = arith.constant 0 : index
      %c0_11 = arith.constant 0 : index
      %12 = vector.load %arg7[%c0_10, %c0_11] : memref<8x512xf32, #tpu.memory_space<vmem>>, vector<8x512xf32>
      %c0_12 = arith.constant 0 : index
      %c0_13 = arith.constant 0 : index
      %13 = vector.load %arg3[%c0_12, %c0_13] : memref<1x512xf32, #tpu.memory_space<vmem>>, vector<1x512xf32>
      %14 = vector.broadcast %13 : vector<1x512xf32> to vector<8x512xf32>
      %15 = arith.addf %12, %14 : vector<8x512xf32>
      %cst_14 = arith.constant 0.000000e+00 : f32
      %16 = vector.broadcast %cst_14 : f32 to vector<8x512xf32>
      %17 = arith.cmpf ogt, %15, %16 : vector<8x512xf32>
      %cst_15 = arith.constant 2.000000e-01 : f32
      %18 = vector.broadcast %cst_15 : f32 to vector<8x512xf32>
      %19 = arith.mulf %18, %15 : vector<8x512xf32>
      %20 = arith.select %17, %15, %19 : vector<8x512xi1>, vector<8x512xf32>
      %21 = arith.truncf %20 : vector<8x512xf32> to vector<8x512xbf16>
      %c0_16 = arith.constant 0 : index
      %c0_17 = arith.constant 0 : index
      %22 = vector.load %arg4[%c0_16, %c0_17] : memref<512x128xbf16, #tpu.memory_space<vmem>>, vector<512x128xbf16>
      %cst_18 = arith.constant dense<0.000000e+00> : vector<8x128xf32>
      %23 = tpu.matmul %21, %22, %cst_18 {dimension_numbers = #tpu.dot_dimension_numbers<[1], [0], [0], [1], [0, 0, 1, 1], [], []>} : vector<8x512xbf16>, vector<512x128xbf16>, vector<8x128xf32> -> vector<8x128xf32>
      %c0_19 = arith.constant 0 : index
      %c0_20 = arith.constant 0 : index
      %24 = vector.load %arg5[%c0_19, %c0_20] : memref<1x128xf32, #tpu.memory_space<vmem>>, vector<1x128xf32>
      %25 = vector.broadcast %24 : vector<1x128xf32> to vector<8x128xf32>
      %26 = arith.addf %23, %25 : vector<8x128xf32>
      %27 = arith.negf %26 : vector<8x128xf32>
      %28 = math.exp %27 : vector<8x128xf32>
      %cst_21 = arith.constant 1.000000e+00 : f32
      %29 = vector.broadcast %cst_21 : f32 to vector<8x128xf32>
      %30 = arith.addf %29, %28 : vector<8x128xf32>
      %31 = arith.divf %29, %30 : vector<8x128xf32>
      %c0_22 = arith.constant 0 : index
      %c0_23 = arith.constant 0 : index
      %32 = vector.load %arg6[%c0_22, %c0_23] : memref<8x128xf32, #tpu.memory_space<vmem>>, vector<8x128xf32>
      tpu.vector_store %arg6[%c0_22, %c0_23], %31 {strides = array<i32>} : memref<8x128xf32, #tpu.memory_space<vmem>>, vector<8x128xf32>,
    } else {
    }
    return
  }
  func.func @transform_0(%arg0: i32) -> (i32, i32) {
    %c0_i32 = arith.constant 0 : i32
    %c0_i32_0 = arith.constant 0 : i32
    return %c0_i32, %arg0 : i32, i32
  }
  func.func @transform_1(%arg0: i32) -> (i32, i32) {
    %c0_i32 = arith.constant 0 : i32
    %c0_i32_0 = arith.constant 0 : i32
    return %arg0, %c0_i32 : i32, i32
  }
  func.func @transform_2(%arg0: i32) -> (i32, i32) {
    %c0_i32 = arith.constant 0 : i32
    %c0_i32_0 = arith.constant 0 : i32
    %c0_i32_1 = arith.constant 0 : i32
    return %c0_i32, %c0_i32_0 : i32, i32
  }
  func.func @transform_3(%arg0: i32) -> (i32, i32) {
    %c0_i32 = arith.constant 0 : i32
    %c0_i32_0 = arith.constant 0 : i32
    %c0_i32_1 = arith.constant 0 : i32
    return %c0_i32, %c0_i32_0 : i32, i32
  }
  func.func @transform_4(%arg0: i32) -> (i32, i32) {
    %c0_i32 = arith.constant 0 : i32
    %c0_i32_0 = arith.constant 0 : i32
    %c0_i32_1 = arith.constant 0 : i32
    return %c0_i32, %c0_i32_0 : i32, i32
  }
  func.func @transform_5(%arg0: i32) -> (i32, i32) {
    %c0_i32 = arith.constant 0 : i32
    %c0_i32_0 = arith.constant 0 : i32
    %c0_i32_1 = arith.constant 0 : i32
    return %c0_i32, %c0_i32_0 : i32, i32
  }
}

</mosaic_0001>

<bundles_post_ra>
// kernel: highres_discriminator_forward.5
= control target key start
LH: loop header
LB: loop body
LE: loop exit
PB: predicated region body
PF: predicated region fallthrough
CT: control target
= control target key end

     0   :  { %s647_s1 = inlined_call_operand.vmem [shape: bf16[128,128], index: 1, kind: input, shape index: {}]   ;;  %s648_s2 = inlined_call_operand.vmem [shape: f32[1,128], index: 2, kind: input, shape index: {}]   ;;  %s649_s0 = inlined_call_operand.vmem [shape: bf16[128,128], index: 0, kind: input, shape index: {}]   ;;  %s650_s3 = inlined_call_operand.vmem [shape: bf16[128,128], index: 3, kind: output, shape index: {}]  }
   0x1   :  { %v461_v0 = vld [vmem:[%s647_s1 + $0x38] sm:$0xff]  ;;  %v460_v1 = vld [vmem:[%s647_s1 + $0x30] sm:$0xff]  ;;  %v459_v2 = vld [vmem:[%s647_s1 + $0x28] sm:$0xff] }
   0x2   :  { %178 = vmatpush.bf16.msra.mxu0 %v461_v0  ;;  %509 = vmatpush.bf16.msra.mxu1 %v461_v0  ;;  %v458_v3 = vld [vmem:[%s647_s1 + $0x20] sm:$0xff]  ;;  %v457_v4 = vld [vmem:[%s647_s1 + $0x18] sm:$0xff]  ;;  %v456_v5 = vld [vmem:[%s647_s1 + $0x10] sm:$0xff] }
   0x3   :  { %510 = vmatpush.bf16.msra.mxu2 %v461_v0  ;;  %511 = vmatpush.bf16.msra.mxu3 %v461_v0  ;;  %v455_v6 = vld [vmem:[%s647_s1 + $0x8] sm:$0xff]  ;;  %v454_v7 = vld [vmem:[%s647_s1] sm:$0xff]  ;;  %v448_v9 = vld [vmem:[%s649_s0 + $0x10] sm:$0xff] }
   0x4   :  { %v446_v8 = vld [vmem:[%s649_s0] sm:$0xff]  ;;  %v452_v11 = vld [vmem:[%s649_s0 + $0x30] sm:$0xff]  ;;  %v447_v12 = vld [vmem:[%s649_s0 + $0x8] sm:$0xff] }
   0x5   :  { %v450_v10 = vld [vmem:[%s649_s0 + $0x20] sm:$0xff]  ;;  %v449_v13 = vld [vmem:[%s649_s0 + $0x18] sm:$0xff]  ;;  %v451_v14 = vld [vmem:[%s649_s0 + $0x28] sm:$0xff] }
   0x6   :  { %179 = vmatpush.bf16.msra.mxu0 %v460_v1  ;;  %512 = vmatpush.bf16.msra.mxu1 %v460_v1  ;;  %v453_v15 = vld [vmem:[%s649_s0 + $0x38] sm:$0xff]  ;;  %v605_v18 = vld [vmem:[%s648_s2] ss:$0 sm:$0xff] }
   0x7   :  { %513 = vmatpush.bf16.msra.mxu2 %v460_v1  ;;  %514 = vmatpush.bf16.msra.mxu3 %v460_v1 }
   0xa   :  { %180 = vmatpush.bf16.msra.mxu0 %v459_v2  ;;  %515 = vmatpush.bf16.msra.mxu1 %v459_v2 }
   0xb   :  { %516 = vmatpush.bf16.msra.mxu2 %v459_v2  ;;  %517 = vmatpush.bf16.msra.mxu3 %v459_v2 }
   0xe   :  { %181 = vmatpush.bf16.msra.mxu0 %v458_v3  ;;  %518 = vmatpush.bf16.msra.mxu1 %v458_v3 }
   0xf   :  { %519 = vmatpush.bf16.msra.mxu2 %v458_v3  ;;  %520 = vmatpush.bf16.msra.mxu3 %v458_v3 }
  0x12   :  { %182 = vmatpush.bf16.msra.mxu0 %v457_v4  ;;  %521 = vmatpush.bf16.msra.mxu1 %v457_v4 }
  0x13   :  { %522 = vmatpush.bf16.msra.mxu2 %v457_v4  ;;  %523 = vmatpush.bf16.msra.mxu3 %v457_v4 }
  0x16   :  { %183 = vmatpush.bf16.msra.mxu0 %v456_v5  ;;  %524 = vmatpush.bf16.msra.mxu1 %v456_v5 }
  0x17   :  { %525 = vmatpush.bf16.msra.mxu2 %v456_v5  ;;  %526 = vmatpush.bf16.msra.mxu3 %v456_v5 }
  0x1a   :  { %184 = vmatpush.bf16.msra.mxu0 %v455_v6  ;;  %527 = vmatpush.bf16.msra.mxu1 %v455_v6 }
  0x1b   :  { %528 = vmatpush.bf16.msra.mxu2 %v455_v6  ;;  %529 = vmatpush.bf16.msra.mxu3 %v455_v6 }
  0x1e   :  { %185 = vmatpush.bf16.msra.mxu0 %v454_v7  ;;  %530 = vmatpush.bf16.msra.mxu1 %v454_v7 }
  0x1f   :  { %531 = vmatpush.bf16.msra.mxu2 %v454_v7  ;;  %532 = vmatpush.bf16.msra.mxu3 %v454_v7 }
  0x21   :  { %186 = vmatmul.bf16.vlgmr.msra.gmra.mxu0 %v446_v8  ;;  %196 = vmatmul.bf16.vlgmr.msra.gmra.mxu1 %v448_v9 }
  0x22   :  { %206 = vmatmul.bf16.vlgmr.msra.gmra.mxu2 %v450_v10  ;;  %216 = vmatmul.bf16.vlgmr.msra.gmra.mxu3 %v452_v11 }
  0x31   :  { %191 = vmatmul.bf16.gmra.mxu0 %v447_v12  ;;  %201 = vmatmul.bf16.gmra.mxu1 %v449_v13 }
  0x32   :  { %211 = vmatmul.bf16.gmra.mxu2 %v451_v14  ;;  %221 = vmatmul.bf16.gmra.mxu3 %v453_v15 }
  0x9e   :  { %v187_v16 = vpop.f32.mrf.mxu0  ;;  %v197_v17 = vpop.f32.mrf.mxu1 }
  0x9f   :  { %v282_v19 = vadd.f32 %v605_v18, %v187_v16  ;;  %v286_v20 = vadd.f32 %v605_v18, %v197_v17 }
  0xa1   :  { %v314_v25 = vmul.f32 0.2, %v282_v19  ;;  %v318_v26 = vmul.f32 0.2, %v286_v20  ;;  %vm298_vm0 = vcmp.gt.f32.partialorder %v282_v19, 0.0  ;;  %vm302_vm1 = vcmp.gt.f32.partialorder %v286_v20, 0.0 }
  0xa3   :  { %v330_v33 = vsel %vm298_vm0, %v282_v19, %v314_v25  ;;  %v334_v34 = vsel %vm302_vm1, %v286_v20, %v318_v26 }
  0xa5   :  { %v207_v21 = vpop.f32.mrf.mxu2  ;;  %v217_v22 = vpop.f32.mrf.mxu3 }
  0xa6   :  { %v189_v23 = vpop.f32.mrf.mxu0  ;;  %v199_v24 = vpop.f32.mrf.mxu1  ;;  %v290_v31 = vadd.f32 %v605_v18, %v207_v21  ;;  %v294_v32 = vadd.f32 %v605_v18, %v217_v22 }
  0xa7   :  { %v283_v27 = vadd.f32 %v605_v18, %v189_v23  ;;  %v287_v28 = vadd.f32 %v605_v18, %v199_v24 }
  0xa8   :  { %v322_v41 = vmul.f32 0.2, %v290_v31  ;;  %v326_v42 = vmul.f32 0.2, %v294_v32  ;;  %vm306_vm4 = vcmp.gt.f32.partialorder %v290_v31, 0.0  ;;  %vm310_vm5 = vcmp.gt.f32.partialorder %v294_v32, 0.0 }
  0xa9   :  { %vm299_vm2 = vcmp.gt.f32.partialorder %v283_v27, 0.0  ;;  %v315_v29 = vmul.f32 0.2, %v283_v27  ;;  %vm303_vm3 = vcmp.gt.f32.partialorder %v287_v28, 0.0  ;;  %v319_v30 = vmul.f32 0.2, %v287_v28 }
  0xaa   :  { %v338_v49 = vsel %vm306_vm4, %v290_v31, %v322_v41  ;;  %v342_v50 = vsel %vm310_vm5, %v294_v32, %v326_v42 }
  0xab   :  { %v331_v35 = vsel %vm299_vm2, %v283_v27, %v315_v29  ;;  %v335_v36 = vsel %vm303_vm3, %v287_v28, %v319_v30 }
  0xac   :  { %v465_v37 = vpack.c.bf16 %v331_v35, %v330_v33  ;;  %v475_v38 = vpack.c.bf16 %v335_v36, %v334_v34 }
  0xad   :  { %v209_v39 = vpop.f32.mrf.mxu2  ;;  %v219_v40 = vpop.f32.mrf.mxu3 }
  0xae   :  { %466 = vst [vmem:[%s650_s3] sm:$0xff] %v465_v37   ;;  %v291_v43 = vadd.f32 %v605_v18, %v209_v39  ;;  %v295_v44 = vadd.f32 %v605_v18, %v219_v40  ;;  %v192_v45 = vpop.f32.mrf.mxu0  ;;  %v202_v46 = vpop.f32.mrf.mxu1 }
  0xaf   :  { %503 = vst [vmem:[%s650_s3 + $0x10] sm:$0xff] %v475_v38   ;;  %v284_v55 = vadd.f32 %v605_v18, %v192_v45  ;;  %v288_v56 = vadd.f32 %v605_v18, %v202_v46 }
  0xb0   :  { %vm307_vm6 = vcmp.gt.f32.partialorder %v291_v43, 0.0  ;;  %v323_v47 = vmul.f32 0.2, %v291_v43  ;;  %vm311_vm7 = vcmp.gt.f32.partialorder %v295_v44, 0.0  ;;  %v327_v48 = vmul.f32 0.2, %v295_v44 }
  0xb1   :  { %v316_v61 = vmul.f32 0.2, %v284_v55  ;;  %v320_v62 = vmul.f32 0.2, %v288_v56  ;;  %vm300_vm8 = vcmp.gt.f32.partialorder %v284_v55, 0.0  ;;  %vm304_vm9 = vcmp.gt.f32.partialorder %v288_v56, 0.0 }
  0xb2   :  { %v339_v51 = vsel %vm307_vm6, %v291_v43, %v323_v47  ;;  %v343_v52 = vsel %vm311_vm7, %v295_v44, %v327_v48 }
  0xb3   :  { %v485_v53 = vpack.c.bf16 %v339_v51, %v338_v49  ;;  %v495_v54 = vpack.c.bf16 %v343_v52, %v342_v50  ;;  %v332_v5 = vsel %vm300_vm8, %v284_v55, %v316_v61  ;;  %v336_v6 = vsel %vm304_vm9, %v288_v56, %v320_v62 }
  0xb5   :  { %505 = vst [vmem:[%s650_s3 + $0x20] sm:$0xff] %v485_v53   ;;  %v212_v57 = vpop.f32.mrf.mxu2  ;;  %v222_v58 = vpop.f32.mrf.mxu3 }
  0xb6   :  { %507 = vst [vmem:[%s650_s3 + $0x30] sm:$0xff] %v495_v54   ;;  %v194_v59 = vpop.f32.mrf.mxu0  ;;  %v204_v60 = vpop.f32.mrf.mxu1  ;;  %v292_v3 = vadd.f32 %v605_v18, %v212_v57  ;;  %v296_v4 = vadd.f32 %v605_v18, %v222_v58 }
  0xb7   :  { %v285_v63 = vadd.f32 %v605_v18, %v194_v59  ;;  %v289_v0 = vadd.f32 %v605_v18, %v204_v60 }
  0xb8   :  { %v324_v13 = vmul.f32 0.2, %v292_v3  ;;  %v328_v14 = vmul.f32 0.2, %v296_v4  ;;  %vm308_vm12 = vcmp.gt.f32.partialorder %v292_v3, 0.0  ;;  %vm312_vm13 = vcmp.gt.f32.partialorder %v296_v4, 0.0 }
  0xb9   :  { %vm301_vm10 = vcmp.gt.f32.partialorder %v285_v63, 0.0  ;;  %v317_v1 = vmul.f32 0.2, %v285_v63  ;;  %vm305_vm11 = vcmp.gt.f32.partialorder %v289_v0, 0.0  ;;  %v321_v2 = vmul.f32 0.2, %v289_v0 }
  0xba   :  { %v340_v20 = vsel %vm308_vm12, %v292_v3, %v324_v13  ;;  %v344_v21 = vsel %vm312_vm13, %v296_v4, %v328_v14 }
  0xbb   :  { %v333_v7 = vsel %vm301_vm10, %v285_v63, %v317_v1  ;;  %v337_v8 = vsel %vm305_vm11, %v289_v0, %v321_v2 }
  0xbc   :  { %v470_v9 = vpack.c.bf16 %v333_v7, %v332_v5  ;;  %v480_v10 = vpack.c.bf16 %v337_v8, %v336_v6 }
  0xbd   :  { %v214_v11 = vpop.f32.mrf.mxu2  ;;  %v224_v12 = vpop.f32.mrf.mxu3 }
  0xbe   :  { %502 = vst [vmem:[%s650_s3 + $0x8] sm:$0xff] %v470_v9   ;;  %v293_v15 = vadd.f32 %v605_v18, %v214_v11  ;;  %v297_v16 = vadd.f32 %v605_v18, %v224_v12 }
  0xbf   :  { %504 = vst [vmem:[%s650_s3 + $0x18] sm:$0xff] %v480_v10  }
  0xc0   :  { %vm309_vm14 = vcmp.gt.f32.partialorder %v293_v15, 0.0  ;;  %v325_v17 = vmul.f32 0.2, %v293_v15  ;;  %vm313_vm15 = vcmp.gt.f32.partialorder %v297_v16, 0.0  ;;  %v329_v19 = vmul.f32 0.2, %v297_v16 }
  0xc2   :  { %v341_v22 = vsel %vm309_vm14, %v293_v15, %v325_v17  ;;  %v345_v23 = vsel %vm313_vm15, %v297_v16, %v329_v19 }
  0xc3   :  { %v490_v24 = vpack.c.bf16 %v341_v22, %v340_v20  ;;  %v500_v25 = vpack.c.bf16 %v345_v23, %v344_v21 }
  0xc5   :  { %506 = vst [vmem:[%s650_s3 + $0x28] sm:$0xff] %v490_v24  }
  0xc6   :  { %508 = vst [vmem:[%s650_s3 + $0x38] sm:$0xff] %v500_v25  }

// kernel: highres_discriminator_forward.6
= control target key start
LH: loop header
LB: loop body
LE: loop exit
PB: predicated region body
PF: predicated region fallthrough
CT: control target
= control target key end

     0   :  { %s1166_s12 = smov 0   ;;  %s1168_s13 = smov 0   ;;  %s1294_s0 = inlined_call_operand.vmem [shape: bf16[32,2048], index: 0, kind: input, shape index: {}]   ;;  %s1295_s1 = inlined_call_operand.vmem [shape: bf16[2048,128], index: 1, kind: input, shape index: {}]   ;;  %s1296_s2 = inlined_call_operand.vmem [shape: f32[1,128], index: 2, kind: input, shape index: {}]   ;;  %s1297_s3 = inlined_call_operand.vmem [shape: bf16[32,128], index: 3, kind: output, shape index: {}]  }
   0x1   :  { %s1170_s14 = smov 0   ;;  %s1172_s15 = smov 0  }
   0x2   :  { %s1174_s16 = smov 0  }
   0x3 LB: > { %s25_s17 = sadd.s32 1, %s1139_s15  ;;  %p48_p1 = scmp.ne.s32.totalorder %s1131_s13, %s1127_s12  ;;  %s1143_s16 = sphi %s1174_s16, %s13_s16   ;;  %s1139_s15 = sphi %s1172_s15, %s1301_s15   ;;  %s1135_s14 = sphi %s1170_s14, %s1300_s14   ;;  %s1131_s13 = sphi %s1168_s13, %s1299_s13   ;;  %s1127_s12 = sphi %s1166_s12, %s1298_s12  }
   0x4   : > { %p26_p0 = scmp.ge.s32.totalorder %s25_s17, 4  ;;  %p49_p2 = scmp.eq.s32.totalorder %s1143_s16, 0 }
   0x5   : > { %s41_s19 = sadd.s32 1, %s1131_s13  ;;  %p837_p5 = scmp.ge.s32.totalorder %s1143_s16, 4 }
   0x6   : > { %s1303_s17 = smov (%p26_p0, %s25_s17), 0  ;;  %p50_p3 = por %p49_p2, %p48_p1 }
   0x7   : > { %s37_s18 = ssub.s32 %s1139_s15, %s1303_s17  ;;  %162 = sbr.rel (%p837_p5) target bundleno = 24 (0x18), region = 20 }
   0x8   : > { %p39_p4 = scmp.eq.s32.totalorder %s37_s18, 0 }
   0xa   : > { %s1201_s20 = scalar_select %p39_p4, %s1131_s13, %s41_s19  }
   0xc   : > { %165 = sbr.rel (!%p50_p3) target bundleno = 24 (0x18), region = 24  ;;  %s167_s21 = sand.u32 (%p50_p3), 1, %s1131_s13  }
   0xd   : > { %s1011_s22 = sshll.u32 (%p50_p3), %s1139_s15, 4  ;;  %s838_s23 = sshll.u32 (%p50_p3), %s167_s21, 6 }
   0xe   : > { %s175_s26 = scalar_lea.vmem (%p50_p3), %s1294_s0, %s1011_s22  ;;  %s169_s27 = scalar_lea.vmem (%p50_p3), [#allocation3], %s838_s23 }
   0xf   : > { %v188_v0 = vld [vmem:[%s175_s26] sm:$0xff] (%p50_p3)  ;;  %v190_v1 = vld [vmem:[%s175_s26 + $0x8] sm:$0xff] (%p50_p3) }
  0x10   : > { %v192_v2 = vld [vmem:[%s175_s26 + $0x40] sm:$0xff] (%p50_p3)  ;;  %189 = vst [vmem:[%s169_s27] sm:$0xff] (%p50_p3), %v188_v0  ;;  %v194_v3 = vld [vmem:[%s175_s26 + $0x48] sm:$0xff] (%p50_p3) }
  0x11   : > { %191 = vst [vmem:[%s169_s27 + $0x8] sm:$0xff] %v190_v1  ;;  %v196_v4 = vld [vmem:[%s175_s26 + $0x80] sm:$0xff]  ;;  %v198_v5 = vld [vmem:[%s175_s26 + $0x88] sm:$0xff] }
  0x12   : > { %193 = vst [vmem:[%s169_s27 + $0x10] sm:$0xff] %v192_v2  ;;  %v200_v6 = vld [vmem:[%s175_s26 + $0xc0] sm:$0xff]  ;;  %v202_v7 = vld [vmem:[%s175_s26 + $0xc8] sm:$0xff] }
  0x13   : > { %195 = vst [vmem:[%s169_s27 + $0x18] sm:$0xff] %v194_v3 }
  0x14   : > { %197 = vst [vmem:[%s169_s27 + $0x20] sm:$0xff] %v196_v4 }
  0x15   : > { %199 = vst [vmem:[%s169_s27 + $0x28] sm:$0xff] %v198_v5 }
  0x16   : > { %201 = vst [vmem:[%s169_s27 + $0x30] sm:$0xff] %v200_v6 }
  0x17   : > { %203 = vst [vmem:[%s169_s27 + $0x38] sm:$0xff] %v202_v7 }
  0x18 PF: > { %p841_p6 = scmp.ge.s32.totalorder %s1143_s16, 1  ;;  %p220_p7 = scmp.lt.s32.totalorder %s1143_s16, 5 }
  0x1a   : > { %p221_p8 = pnand %p841_p6, %p220_p7 }
  0x1b   : > { %s227_s28 = sand.u32 (!%p221_p8), 1, %s1127_s12   ;;  %s843_s29 = sshll.u32 (!%p221_p8), %s1135_s14, 6 }
  0x1c   : > { %224 = sbr.rel (%p221_p8) target bundleno = 255 (0xff), region = 51  ;;  %s842_s30 = sshll.u32 (!%p221_p8), %s227_s28, 6 }
  0x1d   : > { %p267_p9 = scmp.lt.s32.totalorder (!%p221_p8), %s843_s29, 255  ;;  %s1218_s8 = scalar_lea.vmem (!%p221_p8), [#allocation3], %s842_s30 }
  0x1e   : > { %p845_p10 = scmp.ne.s32.totalorder (!%p221_p8), %s1135_s14, 0 }
  0x21   : > { %s1305_s29 = smov (!%p267_p9, %s843_s29), 255  ;;  %290 = sbr.rel (%p845_p10) target bundleno = 43 (0x2b), region = 59 }
  0x22   : > { %s844_s4 = sshll.u32 %s1305_s29, 2 }
  0x23   : > { %s1216_s7 = scalar_lea.vmem %s1295_s1, %s844_s4 }
  0x26   : > { %v1145_v8 = vmov 0.0  }
  0x27   : > { %291 = vst [vmem:[#allocation2 + $0x10] sm:$0xff] %v1145_v8 }
  0x28   : > { %292 = vst [vmem:[#allocation2] sm:$0xff] %v1145_v8 }
  0x29   : > { %293 = vst [vmem:[#allocation2 + $0x18] sm:$0xff] %v1145_v8 }
  0x2a   : > { %294 = vst [vmem:[#allocation2 + $0x8] sm:$0xff] %v1145_v8 }
  0x2b PF: > { %v1027_v9 = vld [vmem:[%s1216_s7 + $0x38] sm:$0xff]  ;;  %v1026_v13 = vld [vmem:[%s1216_s7 + $0x30] sm:$0xff]  ;;  %v1025_v17 = vld [vmem:[%s1216_s7 + $0x28] sm:$0xff]  ;;  %p1006_p11 = scmp.ne.s32.totalorder %s1135_s14, 3 }
  0x2c   : > { %v1035_v10 = vld [vmem:[%s1216_s7 + $0x78] sm:$0xff]  ;;  %603 = vmatpush.bf16.msra.mxu0 %v1027_v9  ;;  %v1034_v14 = vld [vmem:[%s1216_s7 + $0x70] sm:$0xff]  ;;  %v1033_v18 = vld [vmem:[%s1216_s7 + $0x68] sm:$0xff] }
  0x2d   : > { %v1043_v11 = vld [vmem:[%s1216_s7 + $0xb8] sm:$0xff]  ;;  %622 = vmatpush.bf16.msra.mxu1 %v1035_v10  ;;  %v1042_v15 = vld [vmem:[%s1216_s7 + $0xb0] sm:$0xff]  ;;  %v1041_v19 = vld [vmem:[%s1216_s7 + $0xa8] sm:$0xff] }
  0x2e   : > { %v1051_v12 = vld [vmem:[%s1216_s7 + $0xf8] sm:$0xff]  ;;  %641 = vmatpush.bf16.msra.mxu2 %v1043_v11  ;;  %v1050_v16 = vld [vmem:[%s1216_s7 + $0xf0] sm:$0xff]  ;;  %v1049_v20 = vld [vmem:[%s1216_s7 + $0xe8] sm:$0xff] }
  0x2f   : > { %660 = vmatpush.bf16.msra.mxu3 %v1051_v12  ;;  %v1024_v21 = vld [vmem:[%s1216_s7 + $0x20] sm:$0xff]  ;;  %v1023_v25 = vld [vmem:[%s1216_s7 + $0x18] sm:$0xff]  ;;  %v1022_v29 = vld [vmem:[%s1216_s7 + $0x10] sm:$0xff] }
  0x30   : > { %604 = vmatpush.bf16.msra.mxu0 %v1026_v13  ;;  %v1032_v22 = vld [vmem:[%s1216_s7 + $0x60] sm:$0xff]  ;;  %v1031_v26 = vld [vmem:[%s1216_s7 + $0x58] sm:$0xff]  ;;  %v1030_v30 = vld [vmem:[%s1216_s7 + $0x50] sm:$0xff] }
  0x31   : > { %623 = vmatpush.bf16.msra.mxu1 %v1034_v14  ;;  %v1040_v23 = vld [vmem:[%s1216_s7 + $0xa0] sm:$0xff]  ;;  %v1039_v27 = vld [vmem:[%s1216_s7 + $0x98] sm:$0xff]  ;;  %v1038_v31 = vld [vmem:[%s1216_s7 + $0x90] sm:$0xff] }
  0x32   : > { %642 = vmatpush.bf16.msra.mxu2 %v1042_v15  ;;  %v1048_v24 = vld [vmem:[%s1216_s7 + $0xe0] sm:$0xff]  ;;  %v1047_v28 = vld [vmem:[%s1216_s7 + $0xd8] sm:$0xff]  ;;  %v1046_v32 = vld [vmem:[%s1216_s7 + $0xd0] sm:$0xff] }
  0x33   : > { %661 = vmatpush.bf16.msra.mxu3 %v1050_v16  ;;  %v1021_v33 = vld [vmem:[%s1216_s7 + $0x8] sm:$0xff]  ;;  %v1020_v37 = vld [vmem:[%s1216_s7] sm:$0xff]  ;;  %v1014_v42 = vld [vmem:[%s1218_s8 + $0xc] sm:$0xf0] }
  0x34   : > { %605 = vmatpush.bf16.msra.mxu0 %v1025_v17  ;;  %v1029_v34 = vld [vmem:[%s1216_s7 + $0x48] sm:$0xff]  ;;  %v1028_v38 = vld [vmem:[%s1216_s7 + $0x40] sm:$0xff]  ;;  %v850_v44 = vld [vmem:[%s1218_s8 + $0x10] sm:$0xf0] }
  0x35   : > { %624 = vmatpush.bf16.msra.mxu1 %v1033_v18  ;;  %v1037_v35 = vld [vmem:[%s1216_s7 + $0x88] sm:$0xff]  ;;  %v1036_v39 = vld [vmem:[%s1216_s7 + $0x80] sm:$0xff]  ;;  %v1015_v46 = vld [vmem:[%s1218_s8 + $0x14] sm:$0xf0] }
  0x36   : > { %643 = vmatpush.bf16.msra.mxu2 %v1041_v19  ;;  %v1045_v36 = vld [vmem:[%s1216_s7 + $0xc8] sm:$0xff]  ;;  %v1044_v40 = vld [vmem:[%s1216_s7 + $0xc0] sm:$0xff]  ;;  %v858_v48 = vld [vmem:[%s1218_s8 + $0x18] sm:$0xf0] }
  0x37   : > { %662 = vmatpush.bf16.msra.mxu3 %v1049_v20  ;;  %v848_v41 = vld [vmem:[%s1218_s8] sm:$0xf]  ;;  %v1012_v43 = vld [vmem:[%s1218_s8 + $0x4] sm:$0xf]  ;;  %v856_v45 = vld [vmem:[%s1218_s8 + $0x8] sm:$0xf] }
  0x38   : > { %606 = vmatpush.bf16.msra.mxu0 %v1024_v21  ;;  %v1013_v47 = vld [vmem:[%s1218_s8 + $0xc] sm:$0xf]  ;;  %v849_v49 = vor.u32 %v1014_v42, %v848_v41  ;;  %v853_v50 = vor.u32 %v1012_v43, %v850_v44  ;;  %v857_v51 = vor.u32 %v1015_v46, %v856_v45  ;;  %v864_v53 = vld [vmem:[%s1218_s8 + $0x20] sm:$0xf]  ;;  %v1018_v54 = vld [vmem:[%s1218_s8 + $0x2c] sm:$0xf0] }
  0x39   : > { %625 = vmatpush.bf16.msra.mxu1 %v1032_v22  ;;  %v861_v52 = vor.u32 %v1013_v47, %v858_v48  ;;  %v1016_v55 = vld [vmem:[%s1218_s8 + $0x24] sm:$0xf]  ;;  %v866_v56 = vld [vmem:[%s1218_s8 + $0x30] sm:$0xf0]  ;;  %v872_v57 = vld [vmem:[%s1218_s8 + $0x28] sm:$0xf]  ;;  %v865_v61 = vor.u32 %v1018_v54, %v864_v53 }
  0x3a   : > { %644 = vmatpush.bf16.msra.mxu2 %v1040_v23  ;;  %v1019_v58 = vld [vmem:[%s1218_s8 + $0x34] sm:$0xf0]  ;;  %v1017_v59 = vld [vmem:[%s1218_s8 + $0x2c] sm:$0xf]  ;;  %v874_v60 = vld [vmem:[%s1218_s8 + $0x38] sm:$0xf0]  ;;  %v869_v62 = vor.u32 %v1016_v55, %v866_v56 }
  0x3b   : > { %663 = vmatpush.bf16.msra.mxu3 %v1048_v24  ;;  %v873_v63 = vor.u32 %v1019_v58, %v872_v57  ;;  %v877_v0 = vor.u32 %v1017_v59, %v874_v60  ;;  %v295_v9 = vld [vmem:[#allocation2 + $0x10] sm:$0xff]  ;;  %v296_v16 = vld [vmem:[#allocation2] sm:$0xff] }
  0x3c   : > { %607 = vmatpush.bf16.msra.mxu0 %v1023_v25  ;;  %v297_v25 = vld [vmem:[#allocation2 + $0x18] sm:$0xff] }
  0x3d   : > { %626 = vmatpush.bf16.msra.mxu1 %v1031_v26 }
  0x3e   : > { %645 = vmatpush.bf16.msra.mxu2 %v1039_v27 }
  0x3f   : > { %664 = vmatpush.bf16.msra.mxu3 %v1047_v28 }
  0x40   : > { %608 = vmatpush.bf16.msra.mxu0 %v1022_v29 }
  0x41   : > { %627 = vmatpush.bf16.msra.mxu1 %v1030_v30 }
  0x42   : > { %646 = vmatpush.bf16.msra.mxu2 %v1038_v31 }
  0x43   : > { %665 = vmatpush.bf16.msra.mxu3 %v1046_v32 }
  0x44   : > { %609 = vmatpush.bf16.msra.mxu0 %v1021_v33  ;;  %v298_v33 = vld [vmem:[#allocation2 + $0x8] sm:$0xff] }
  0x45   : > { %628 = vmatpush.bf16.msra.mxu1 %v1029_v34 }
  0x46   : > { %647 = vmatpush.bf16.msra.mxu2 %v1037_v35 }
  0x47   : > { %666 = vmatpush.bf16.msra.mxu3 %v1045_v36 }
  0x48   : > { %610 = vmatpush.bf16.msra.mxu0 %v1020_v37 }
  0x49   : > { %629 = vmatpush.bf16.msra.mxu1 %v1028_v38 }
  0x4a   : > { %648 = vmatpush.bf16.msra.mxu2 %v1036_v39 }
  0x4b   : > { %667 = vmatpush.bf16.msra.mxu3 %v1044_v40  ;;  %611 = vmatmul.bf16.vlgmr.msra.gmra.mxu0 %v849_v49 }
  0x4c   : > { %630 = vmatmul.bf16.vlgmr.msra.gmra.mxu1 %v853_v50 }
  0x4d   : > { %649 = vmatmul.bf16.vlgmr.msra.gmra.mxu2 %v857_v51 }
  0x4e   : > { %668 = vmatmul.bf16.vlgmr.msra.gmra.mxu3 %v861_v52 }
  0x5b   : > { %616 = vmatmul.bf16.gmra.mxu0 %v865_v61 }
  0x5c   : > { %635 = vmatmul.bf16.gmra.mxu1 %v869_v62 }
  0x5d   : > { %654 = vmatmul.bf16.gmra.mxu2 %v873_v63 }
  0x5e   : > { %673 = vmatmul.bf16.gmra.mxu3 %v877_v0 }
  0xc8   : > { %v612_v1 = vpop.f32.mrf.mxu0 }
  0xc9   : > { %v631_v2 = vpop.f32.mrf.mxu1 }
  0xca   : > { %v632_v3 = vadd.f32 %v631_v2, %v612_v1 }
  0xd0   : > { %v650_v4 = vpop.f32.mrf.mxu2  ;;  %v614_v7 = vpop.f32.mrf.mxu0 }
  0xd1   : > { %v669_v5 = vpop.f32.mrf.mxu3  ;;  %v651_v6 = vadd.f32 %v650_v4, %v632_v3  ;;  %v633_v8 = vpop.f32.mrf.mxu1 }
  0xd2   : > { %v634_v12 = vadd.f32 %v633_v8, %v614_v7 }
  0xd3   : > { %v670_v10 = vadd.f32 %v669_v5, %v651_v6 }
  0xd5   : > { %v679_v11 = vadd.f32 %v670_v10, %v295_v9 }
  0xd7   : > { %683 = vst [vmem:[#allocation2 + $0x10] sm:$0xff] %v679_v11 }
  0xd8   : > { %v652_v13 = vpop.f32.mrf.mxu2  ;;  %v617_v17 = vpop.f32.mrf.mxu0 }
  0xd9   : > { %v671_v14 = vpop.f32.mrf.mxu3  ;;  %v653_v15 = vadd.f32 %v652_v13, %v634_v12  ;;  %v636_v18 = vpop.f32.mrf.mxu1 }
  0xda   : > { %v637_v21 = vadd.f32 %v636_v18, %v617_v17 }
  0xdb   : > { %v672_v19 = vadd.f32 %v671_v14, %v653_v15 }
  0xdd   : > { %v680_v20 = vadd.f32 %v672_v19, %v296_v16 }
  0xdf   : > { %684 = vst [vmem:[#allocation2] sm:$0xff] %v680_v20 }
  0xe0   : > { %v655_v22 = vpop.f32.mrf.mxu2  ;;  %v619_v27 = vpop.f32.mrf.mxu0 }
  0xe1   : > { %v674_v23 = vpop.f32.mrf.mxu3  ;;  %v656_v24 = vadd.f32 %v655_v22, %v637_v21  ;;  %v638_v28 = vpop.f32.mrf.mxu1 }
  0xe2   : > { %v639_v30 = vadd.f32 %v638_v28, %v619_v27 }
  0xe3   : > { %v675_v26 = vadd.f32 %v674_v23, %v656_v24 }
  0xe5   : > { %v681_v29 = vadd.f32 %v675_v26, %v297_v25 }
  0xe7   : > { %685 = vst [vmem:[#allocation2 + $0x18] sm:$0xff] %v681_v29 }
  0xe8   : > { %v657_v31 = vpop.f32.mrf.mxu2 }
  0xe9   : > { %v658_v32 = vadd.f32 %v657_v31, %v639_v30  ;;  %v676_v34 = vpop.f32.mrf.mxu3 }
  0xeb   : > { %v677_v35 = vadd.f32 %v676_v34, %v658_v32  ;;  %690 = sbr.rel (%p1006_p11) target bundleno = 255 (0xff), region = 63 }
  0xed   : > { %v682_v36 = vadd.f32 %v677_v35, %v298_v33 }
  0xef   : > { %686 = vst [vmem:[#allocation2 + $0x8] sm:$0xff] %v682_v36 }
  0xf0   : > { %v691_v37 = vld [vmem:[#allocation2 + $0x10] sm:$0xff]  ;;  %v692_v38 = vld [vmem:[#allocation2] sm:$0xff]  ;;  %v693_v40 = vld [vmem:[#allocation2 + $0x18] sm:$0xff] }
  0xf1   : > { %v1104_v39 = vld [vmem:[%s1296_s2] ss:$0 sm:$0xff] }
  0xf2   : > { %v699_v42 = vadd.f32 %v1104_v39, %v691_v37  ;;  %v700_v43 = vadd.f32 %v1104_v39, %v692_v38  ;;  %v701_v44 = vadd.f32 %v1104_v39, %v693_v40 }
  0xf4   : > { %vm703_vm0 = vcmp.gt.f32.partialorder %v699_v42, 0.0  ;;  %vm704_vm1 = vcmp.gt.f32.partialorder %v700_v43, 0.0  ;;  %v707_v46 = vmul.f32 0.2, %v699_v42  ;;  %v708_v47 = vmul.f32 0.2, %v700_v43 }
  0xf5   : > { %vm705_vm2 = vcmp.gt.f32.partialorder %v701_v44, 0.0  ;;  %v709_v48 = vmul.f32 0.2, %v701_v44 }
  0xf6   : > { %v694_v41 = vld [vmem:[#allocation2 + $0x8] sm:$0xff]  ;;  %v711_v50 = vsel %vm703_vm0, %v699_v42, %v707_v46  ;;  %v712_v51 = vsel %vm704_vm1, %v700_v43, %v708_v47 }
  0xf7   : > { %v702_v45 = vadd.f32 %v1104_v39, %v694_v41  ;;  %v1055_v52 = vpack.c.bf16 %v712_v51, %v711_v50  ;;  %v713_v53 = vsel %vm705_vm2, %v701_v44, %v709_v48 }
  0xf9   : > { %vm706_vm3 = vcmp.gt.f32.partialorder %v702_v45, 0.0  ;;  %v710_v49 = vmul.f32 0.2, %v702_v45  ;;  %1056 = vst [vmem:[%s1297_s3] sm:$0xff] %v1055_v52  }
  0xfb   : > { %v714_v54 = vsel %vm706_vm3, %v702_v45, %v710_v49 }
  0xfc   : > { %v1060_v55 = vpack.c.bf16 %v714_v54, %v713_v53 }
  0xfe   : > { %1062 = vst [vmem:[%s1297_s3 + $0x8] sm:$0xff] %v1060_v55  }
  0xff PF: > { %s13_s16 = sadd.s32 1, %s1143_s16   ;;  %s1298_s12 = smov %s1131_s13 }
 0x100   : > { %p10_p12 = scmp.ge.s32.totalorder %s13_s16, 6   ;;  %s1299_s13 = smov %s1201_s20 }
 0x101   : > { %s1300_s14 = smov %s1139_s15  ;;  %s1301_s15 = smov %s1303_s17 }
 0x102   :  { %12 = sbr.rel (!%p10_p12) target bundleno = 3 (0x3), region = 104 }

// kernel: highres_discriminator_forward.7
= control target key start
LH: loop header
LB: loop body
LE: loop exit
PB: predicated region body
PF: predicated region fallthrough
CT: control target
= control target key end

     0   :  { %s956_s12 = smov 0   ;;  %s958_s13 = smov 0   ;;  %s1039_s0 = inlined_call_operand.vmem [shape: bf16[8,2048], index: 0, kind: input, shape index: {}]   ;;  %s1040_s1 = inlined_call_operand.vmem [shape: bf16[2048,128], index: 1, kind: input, shape index: {}]   ;;  %s1041_s2 = inlined_call_operand.vmem [shape: f32[1,128], index: 2, kind: input, shape index: {}]   ;;  %s1042_s3 = inlined_call_operand.vmem [shape: bf16[8,128], index: 3, kind: output, shape index: {}]  }
   0x1   :  { %s960_s14 = smov 0  }
   0x2 LB: > { %s25_s15 = sadd.s32 1, %s929_s13  ;;  %p715_p0 = scmp.ge.s32.totalorder %s933_s14, 1  ;;  %s933_s14 = sphi %s960_s14, %s13_s14   ;;  %s929_s13 = sphi %s958_s13, %s1044_s13   ;;  %s925_s12 = sphi %s956_s12, %s1043_s12  }
   0x3   : > { %p26_p1 = scmp.ge.s32.totalorder %s25_s15, 4  ;;  %p189_p2 = scmp.lt.s32.totalorder %s933_s14, 5 }
   0x5   : > { %s1046_s15 = smov (%p26_p1, %s25_s15), 0  ;;  %p190_p3 = pnand %p715_p0, %p189_p2 }
   0x6   : > { %s716_s16 = sshll.u32 (!%p190_p3), %s925_s12, 2  ;;  %s718_s17 = sshll.u32 (!%p190_p3), %s925_s12, 6 }
   0x7   : > { %193 = sbr.rel (%p190_p3) target bundleno = 210 (0xd2), region = 32  ;;  %p233_p4 = scmp.lt.s32.totalorder (!%p190_p3), %s716_s16, 15 }
   0x8   : > { %p241_p5 = scmp.lt.s32.totalorder (!%p190_p3), %s718_s17, 255  ;;  %p720_p6 = scmp.ne.s32.totalorder (!%p190_p3), %s925_s12, 0 }
   0xc   : > { %s1048_s16 = smov (!%p233_p4, %s716_s16), 15  ;;  %s1050_s17 = smov (!%p241_p5, %s718_s17), 255 }
   0xd   : > { %s717_s18 = sshll.u32 %s1048_s16, 2  ;;  %s719_s22 = sshll.u32 %s1050_s17, 2 }
   0xe   : > { %s981_s21 = scalar_lea.vmem %s1039_s0, %s717_s18  ;;  %s986_s25 = scalar_lea.vmem %s1040_s1, %s719_s22 }
   0xf   : > { %262 = sbr.rel (%p720_p6) target bundleno = 22 (0x16), region = 36 }
  0x14   : > { %v935_v0 = vmov 0.0  }
  0x15   : > { %263 = vst [vmem:[#allocation2] sm:$0xff] %v935_v0 }
  0x16 PF: > { %v860_v1 = vld [vmem:[%s986_s25 + $0x38] sm:$0xff]  ;;  %v859_v5 = vld [vmem:[%s986_s25 + $0x30] sm:$0xff]  ;;  %v858_v9 = vld [vmem:[%s986_s25 + $0x28] sm:$0xff]  ;;  %p849_p7 = scmp.ne.s32.totalorder %s925_s12, 3 }
  0x17   : > { %v868_v2 = vld [vmem:[%s986_s25 + $0x78] sm:$0xff]  ;;  %537 = vmatpush.bf16.msra.mxu0 %v860_v1  ;;  %v867_v6 = vld [vmem:[%s986_s25 + $0x70] sm:$0xff]  ;;  %v866_v10 = vld [vmem:[%s986_s25 + $0x68] sm:$0xff] }
  0x18   : > { %v876_v3 = vld [vmem:[%s986_s25 + $0xb8] sm:$0xff]  ;;  %550 = vmatpush.bf16.msra.mxu1 %v868_v2  ;;  %v875_v7 = vld [vmem:[%s986_s25 + $0xb0] sm:$0xff]  ;;  %v874_v11 = vld [vmem:[%s986_s25 + $0xa8] sm:$0xff] }
  0x19   : > { %v884_v4 = vld [vmem:[%s986_s25 + $0xf8] sm:$0xff]  ;;  %563 = vmatpush.bf16.msra.mxu2 %v876_v3  ;;  %v883_v8 = vld [vmem:[%s986_s25 + $0xf0] sm:$0xff]  ;;  %v882_v12 = vld [vmem:[%s986_s25 + $0xe8] sm:$0xff] }
  0x1a   : > { %576 = vmatpush.bf16.msra.mxu3 %v884_v4  ;;  %v857_v13 = vld [vmem:[%s986_s25 + $0x20] sm:$0xff]  ;;  %v856_v17 = vld [vmem:[%s986_s25 + $0x18] sm:$0xff]  ;;  %v855_v21 = vld [vmem:[%s986_s25 + $0x10] sm:$0xff] }
  0x1b   : > { %538 = vmatpush.bf16.msra.mxu0 %v859_v5  ;;  %v865_v14 = vld [vmem:[%s986_s25 + $0x60] sm:$0xff]  ;;  %v864_v18 = vld [vmem:[%s986_s25 + $0x58] sm:$0xff]  ;;  %v863_v22 = vld [vmem:[%s986_s25 + $0x50] sm:$0xff] }
  0x1c   : > { %551 = vmatpush.bf16.msra.mxu1 %v867_v6  ;;  %v873_v15 = vld [vmem:[%s986_s25 + $0xa0] sm:$0xff]  ;;  %v872_v19 = vld [vmem:[%s986_s25 + $0x98] sm:$0xff]  ;;  %v871_v23 = vld [vmem:[%s986_s25 + $0x90] sm:$0xff] }
  0x1d   : > { %564 = vmatpush.bf16.msra.mxu2 %v875_v7  ;;  %v881_v16 = vld [vmem:[%s986_s25 + $0xe0] sm:$0xff]  ;;  %v880_v20 = vld [vmem:[%s986_s25 + $0xd8] sm:$0xff]  ;;  %v879_v24 = vld [vmem:[%s986_s25 + $0xd0] sm:$0xff] }
  0x1e   : > { %577 = vmatpush.bf16.msra.mxu3 %v883_v8  ;;  %v854_v25 = vld [vmem:[%s986_s25 + $0x8] sm:$0xff]  ;;  %v265_v27 = vld [vmem:[%s981_s21] sm:$0xff] }
  0x1f   : > { %539 = vmatpush.bf16.msra.mxu0 %v858_v9  ;;  %v862_v26 = vld [vmem:[%s986_s25 + $0x48] sm:$0xff]  ;;  %v333_v31 = vunpack.c.l.b16 %v265_v27  ;;  %v334_v32 = vunpack.c.h.b16 %v265_v27  ;;  %v853_v33 = vld [vmem:[%s986_s25] sm:$0xff] }
  0x20   : > { %552 = vmatpush.bf16.msra.mxu1 %v866_v10  ;;  %v870_v28 = vld [vmem:[%s986_s25 + $0x88] sm:$0xff]  ;;  %v861_v34 = vld [vmem:[%s986_s25 + $0x40] sm:$0xff] }
  0x21   : > { %565 = vmatpush.bf16.msra.mxu2 %v874_v11  ;;  %v878_v29 = vld [vmem:[%s986_s25 + $0xc8] sm:$0xff]  ;;  %v869_v37 = vld [vmem:[%s986_s25 + $0x80] sm:$0xff]  ;;  %v337_v39 = vpack.c.b16 %v333_v31, %v333_v31  ;;  %v338_v40 = vpack.c.b16 %v334_v32, %v334_v32 }
  0x22   : > { %578 = vmatpush.bf16.msra.mxu3 %v882_v12  ;;  %v266_v30 = vld [vmem:[%s981_s21 + $0x8] sm:$0xff]  ;;  %v877_v38 = vld [vmem:[%s986_s25 + $0xc0] sm:$0xff] }
  0x23   : > { %540 = vmatpush.bf16.msra.mxu0 %v857_v13  ;;  %v335_v35 = vunpack.c.l.b16 %v266_v30  ;;  %v336_v36 = vunpack.c.h.b16 %v266_v30  ;;  %v264_v51 = vld [vmem:[#allocation2] sm:$0xff] }
  0x24   : > { %553 = vmatpush.bf16.msra.mxu1 %v865_v14 }
  0x25   : > { %566 = vmatpush.bf16.msra.mxu2 %v873_v15  ;;  %v339_v41 = vpack.c.b16 %v335_v35, %v335_v35  ;;  %v340_v42 = vpack.c.b16 %v336_v36, %v336_v36 }
  0x26   : > { %579 = vmatpush.bf16.msra.mxu3 %v881_v16 }
  0x27   : > { %541 = vmatpush.bf16.msra.mxu0 %v856_v17 }
  0x28   : > { %554 = vmatpush.bf16.msra.mxu1 %v864_v18 }
  0x29   : > { %567 = vmatpush.bf16.msra.mxu2 %v872_v19 }
  0x2a   : > { %580 = vmatpush.bf16.msra.mxu3 %v880_v20 }
  0x2b   : > { %542 = vmatpush.bf16.msra.mxu0 %v855_v21 }
  0x2c   : > { %555 = vmatpush.bf16.msra.mxu1 %v863_v22 }
  0x2d   : > { %568 = vmatpush.bf16.msra.mxu2 %v871_v23 }
  0x2e   : > { %581 = vmatpush.bf16.msra.mxu3 %v879_v24 }
  0x2f   : > { %543 = vmatpush.bf16.msra.mxu0 %v854_v25 }
  0x30   : > { %556 = vmatpush.bf16.msra.mxu1 %v862_v26 }
  0x31   : > { %569 = vmatpush.bf16.msra.mxu2 %v870_v28 }
  0x32   : > { %582 = vmatpush.bf16.msra.mxu3 %v878_v29 }
  0x33   : > { %544 = vmatpush.bf16.msra.mxu0 %v853_v33 }
  0x34   : > { %557 = vmatpush.bf16.msra.mxu1 %v861_v34 }
  0x35   : > { %570 = vmatpush.bf16.msra.mxu2 %v869_v37 }
  0x36   : > { %583 = vmatpush.bf16.msra.mxu3 %v877_v38  ;;  %545 = vmatmul.bf16.vlgmr.msra.gmra.mxu0 %v337_v39 }
  0x37   : > { %558 = vmatmul.bf16.vlgmr.msra.gmra.mxu1 %v338_v40 }
  0x38   : > { %571 = vmatmul.bf16.vlgmr.msra.gmra.mxu2 %v339_v41 }
  0x39   : > { %584 = vmatmul.bf16.vlgmr.msra.gmra.mxu3 %v340_v42 }
  0xb3   : > { %v546_v43 = vpop.f32.mrf.mxu0 }
  0xb4   : > { %v559_v44 = vpop.f32.mrf.mxu1 }
  0xb5   : > { %v560_v45 = vadd.f32 %v559_v44, %v546_v43 }
  0xbb   : > { %v572_v46 = vpop.f32.mrf.mxu2  ;;  %v548_v49 = vpop.f32.mrf.mxu0 }
  0xbc   : > { %v585_v47 = vpop.f32.mrf.mxu3  ;;  %v573_v48 = vadd.f32 %v572_v46, %v560_v45  ;;  %v561_v50 = vpop.f32.mrf.mxu1 }
  0xbe   : > { %v586_v52 = vadd.f32 %v585_v47, %v573_v48 }
  0xc0   : > { %v589_v53 = vadd.f32 %v586_v52, %v264_v51  ;;  %594 = sbr.rel (%p849_p7) target bundleno = 210 (0xd2), region = 40 }
  0xc2   : > { %590 = vst [vmem:[#allocation2] sm:$0xff] %v589_v53 }
  0xc3   : > { %v574_v54 = vpop.f32.mrf.mxu2 }
  0xc4   : > { %v587_v55 = vpop.f32.mrf.mxu3 }
  0xc5   : > { %v910_v57 = vld [vmem:[%s1041_s2] ss:$0 sm:$0xff] }
  0xc9   : > { %v595_v56 = vld [vmem:[#allocation2] sm:$0xff] }
  0xca   : > { %v600_v58 = vadd.f32 %v910_v57, %v595_v56 }
  0xcc   : > { %vm601_vm0 = vcmp.gt.f32.partialorder %v600_v58, 0.0  ;;  %v602_v59 = vmul.f32 0.2, %v600_v58 }
  0xce   : > { %v603_v60 = vsel %vm601_vm0, %v600_v58, %v602_v59 }
  0xcf   : > { %v604_v61 = vpack.c.bf16 %v603_v60, %v603_v60 }
  0xd1   : > { %605 = vst [vmem:[%s1042_s3] sm:$0xf] %v604_v61 }
  0xd2 PF: > { %s13_s14 = sadd.s32 1, %s933_s14   ;;  %s1043_s12 = smov %s929_s13 }
  0xd3   : > { %p10_p8 = scmp.ge.s32.totalorder %s13_s14, 6   ;;  %s1044_s13 = smov %s1046_s15 }
  0xd5   :  { %12 = sbr.rel (!%p10_p8) target bundleno = 2 (0x2), region = 76 }

// kernel: highres_discriminator_forward.8
= control target key start
LH: loop header
LB: loop body
LE: loop exit
PB: predicated region body
PF: predicated region fallthrough
CT: control target
= control target key end

     0   :  { %s1339_s12 = smov 0   ;;  %s1341_s13 = smov 0   ;;  %s1534_s0 = inlined_call_operand.vmem [shape: bf16[8,2048], index: 0, kind: input, shape index: {}]   ;;  %s1535_s1 = inlined_call_operand.vmem [shape: bf16[2048,256], index: 1, kind: input, shape index: {}]   ;;  %s1536_s2 = inlined_call_operand.vmem [shape: f32[1,256], index: 2, kind: input, shape index: {}]   ;;  %s1537_s3 = inlined_call_operand.vmem [shape: bf16[8,256], index: 3, kind: output, shape index: {}]  }
   0x1   :  { %s1343_s14 = smov 0  }
   0x2 LB: > { %s25_s15 = sadd.s32 1, %s1312_s13  ;;  %p936_p0 = scmp.ge.s32.totalorder %s1316_s14, 1  ;;  %s1316_s14 = sphi %s1343_s14, %s13_s14   ;;  %s1312_s13 = sphi %s1341_s13, %s1539_s13   ;;  %s1308_s12 = sphi %s1339_s12, %s1538_s12  }
   0x3   : > { %p26_p1 = scmp.ge.s32.totalorder %s25_s15, 4  ;;  %p194_p2 = scmp.lt.s32.totalorder %s1316_s14, 5 }
   0x5   : > { %s1541_s15 = smov (%p26_p1, %s25_s15), 0  ;;  %p195_p3 = pnand %p936_p0, %p194_p2 }
   0x6   : > { %s937_s16 = sshll.u32 (!%p195_p3), %s1308_s12, 2  ;;  %s939_s17 = sshll.u32 (!%p195_p3), %s1308_s12, 6 }
   0x7   : > { %198 = sbr.rel (%p195_p3) target bundleno = 245 (0xf5), region = 32  ;;  %p243_p4 = scmp.lt.s32.totalorder (!%p195_p3), %s937_s16, 15 }
   0x8   : > { %p252_p5 = scmp.lt.s32.totalorder (!%p195_p3), %s939_s17, 255  ;;  %p942_p6 = scmp.ne.s32.totalorder (!%p195_p3), %s1308_s12, 0 }
   0xc   : > { %s1543_s16 = smov (!%p243_p4, %s937_s16), 15  ;;  %s1545_s17 = smov (!%p252_p5, %s939_s17), 255 }
   0xd   : > { %s938_s18 = sshll.u32 %s1543_s16, 2  ;;  %s1204_s22 = sshll.u32 %s1545_s17, 3 }
   0xe   : > { %s1364_s21 = scalar_lea.vmem %s1534_s0, %s938_s18  ;;  %s1369_s25 = scalar_lea.vmem %s1535_s1, %s1204_s22 }
   0xf   : > { %280 = sbr.rel (%p942_p6) target bundleno = 23 (0x17), region = 36 }
  0x14   : > { %v1318_v0 = vmov 0.0  }
  0x15   : > { %281 = vst [vmem:[#allocation2] sm:$0xff] %v1318_v0 }
  0x16   : > { %282 = vst [vmem:[#allocation2 + $0x8] sm:$0xff] %v1318_v0 }
  0x17 PF: > { %v1001_v1 = vld [vmem:[%s1369_s25 + $0x70] sm:$0xf]  ;;  %v1220_v2 = vld [vmem:[%s1369_s25 + $0x74] sm:$0xf0]  ;;  %v993_v12 = vld [vmem:[%s1369_s25 + $0x60] sm:$0xf] }
  0x18   : > { %v1065_v3 = vld [vmem:[%s1369_s25 + $0xf0] sm:$0xf]  ;;  %v1002_v4 = vor.u32 %v1220_v2, %v1001_v1  ;;  %v1236_v5 = vld [vmem:[%s1369_s25 + $0xf4] sm:$0xf0]  ;;  %v1218_v14 = vld [vmem:[%s1369_s25 + $0x64] sm:$0xf0] }
  0x19   : > { %v1129_v6 = vld [vmem:[%s1369_s25 + $0x170] sm:$0xf]  ;;  %v1252_v7 = vld [vmem:[%s1369_s25 + $0x174] sm:$0xf0]  ;;  %v1066_v8 = vor.u32 %v1236_v5, %v1065_v3  ;;  %v1057_v15 = vld [vmem:[%s1369_s25 + $0xe0] sm:$0xf]  ;;  %v994_v17 = vor.u32 %v1218_v14, %v993_v12 }
  0x1a   : > { %v1130_v9 = vor.u32 %v1252_v7, %v1129_v6  ;;  %v1193_v10 = vld [vmem:[%s1369_s25 + $0x1f0] sm:$0xf]  ;;  %v1268_v11 = vld [vmem:[%s1369_s25 + $0x1f4] sm:$0xf0]  ;;  %685 = vmatpush.bf16.msra.mxu0 %v1002_v4  ;;  %v1234_v16 = vld [vmem:[%s1369_s25 + $0xe4] sm:$0xf0] }
  0x1b   : > { %v1194_v13 = vor.u32 %v1268_v11, %v1193_v10  ;;  %698 = vmatpush.bf16.msra.mxu1 %v1066_v8  ;;  %v1058_v18 = vor.u32 %v1234_v16, %v1057_v15  ;;  %v1121_v19 = vld [vmem:[%s1369_s25 + $0x160] sm:$0xf]  ;;  %v1250_v20 = vld [vmem:[%s1369_s25 + $0x164] sm:$0xf0]  ;;  %v985_v24 = vld [vmem:[%s1369_s25 + $0x50] sm:$0xf] }
  0x1c   : > { %711 = vmatpush.bf16.msra.mxu2 %v1130_v9  ;;  %v1185_v21 = vld [vmem:[%s1369_s25 + $0x1e0] sm:$0xf]  ;;  %v1122_v22 = vor.u32 %v1250_v20, %v1121_v19  ;;  %v1266_v23 = vld [vmem:[%s1369_s25 + $0x1e4] sm:$0xf0]  ;;  %v1216_v25 = vld [vmem:[%s1369_s25 + $0x54] sm:$0xf0] }
  0x1d   : > { %724 = vmatpush.bf16.msra.mxu3 %v1194_v13  ;;  %v1186_v26 = vor.u32 %v1266_v23, %v1185_v21  ;;  %v1049_v27 = vld [vmem:[%s1369_s25 + $0xd0] sm:$0xf]  ;;  %v1232_v28 = vld [vmem:[%s1369_s25 + $0xd4] sm:$0xf0]  ;;  %v986_v30 = vor.u32 %v1216_v25, %v985_v24  ;;  %v977_v36 = vld [vmem:[%s1369_s25 + $0x40] sm:$0xf] }
  0x1e   : > { %v1113_v29 = vld [vmem:[%s1369_s25 + $0x150] sm:$0xf]  ;;  %686 = vmatpush.bf16.msra.mxu0 %v994_v17  ;;  %v1248_v31 = vld [vmem:[%s1369_s25 + $0x154] sm:$0xf0]  ;;  %v1050_v34 = vor.u32 %v1232_v28, %v1049_v27  ;;  %v1214_v37 = vld [vmem:[%s1369_s25 + $0x44] sm:$0xf0] }
  0x1f   : > { %v1177_v32 = vld [vmem:[%s1369_s25 + $0x1d0] sm:$0xf]  ;;  %v1264_v33 = vld [vmem:[%s1369_s25 + $0x1d4] sm:$0xf0]  ;;  %699 = vmatpush.bf16.msra.mxu1 %v1058_v18  ;;  %v1114_v35 = vor.u32 %v1248_v31, %v1113_v29  ;;  %v1041_v38 = vld [vmem:[%s1369_s25 + $0xc0] sm:$0xf]  ;;  %v978_v45 = vor.u32 %v1214_v37, %v977_v36 }
  0x20   : > { %712 = vmatpush.bf16.msra.mxu2 %v1122_v22  ;;  %v1178_v39 = vor.u32 %v1264_v33, %v1177_v32  ;;  %v1230_v40 = vld [vmem:[%s1369_s25 + $0xc4] sm:$0xf0]  ;;  %v1105_v41 = vld [vmem:[%s1369_s25 + $0x140] sm:$0xf]  ;;  %v969_v48 = vld [vmem:[%s1369_s25 + $0x30] sm:$0xf] }
  0x21   : > { %725 = vmatpush.bf16.msra.mxu3 %v1186_v26  ;;  %v1246_v42 = vld [vmem:[%s1369_s25 + $0x144] sm:$0xf0]  ;;  %v1169_v43 = vld [vmem:[%s1369_s25 + $0x1c0] sm:$0xf]  ;;  %v1042_v46 = vor.u32 %v1230_v40, %v1041_v38  ;;  %v1212_v49 = vld [vmem:[%s1369_s25 + $0x34] sm:$0xf0] }
  0x22   : > { %v1262_v44 = vld [vmem:[%s1369_s25 + $0x1c4] sm:$0xf0]  ;;  %687 = vmatpush.bf16.msra.mxu0 %v986_v30  ;;  %v1106_v47 = vor.u32 %v1246_v42, %v1105_v41  ;;  %v1033_v50 = vld [vmem:[%s1369_s25 + $0xb0] sm:$0xf]  ;;  %v1228_v52 = vld [vmem:[%s1369_s25 + $0xb4] sm:$0xf0]  ;;  %v970_v57 = vor.u32 %v1212_v49, %v969_v48 }
  0x23   : > { %700 = vmatpush.bf16.msra.mxu1 %v1050_v34  ;;  %v1170_v51 = vor.u32 %v1262_v44, %v1169_v43  ;;  %v1097_v53 = vld [vmem:[%s1369_s25 + $0x130] sm:$0xf]  ;;  %v1244_v54 = vld [vmem:[%s1369_s25 + $0x134] sm:$0xf0]  ;;  %v1034_v58 = vor.u32 %v1228_v52, %v1033_v50  ;;  %v961_v60 = vld [vmem:[%s1369_s25 + $0x20] sm:$0xf] }
  0x24   : > { %713 = vmatpush.bf16.msra.mxu2 %v1114_v35  ;;  %v1161_v55 = vld [vmem:[%s1369_s25 + $0x1b0] sm:$0xf]  ;;  %v1260_v56 = vld [vmem:[%s1369_s25 + $0x1b4] sm:$0xf0]  ;;  %v1098_v59 = vor.u32 %v1244_v54, %v1097_v53  ;;  %v1210_v61 = vld [vmem:[%s1369_s25 + $0x24] sm:$0xf0] }
  0x25   : > { %726 = vmatpush.bf16.msra.mxu3 %v1178_v39  ;;  %v1025_v62 = vld [vmem:[%s1369_s25 + $0xa0] sm:$0xf]  ;;  %v1162_v63 = vor.u32 %v1260_v56, %v1161_v55  ;;  %v1226_v0 = vld [vmem:[%s1369_s25 + $0xa4] sm:$0xf0]  ;;  %v962_v5 = vor.u32 %v1210_v61, %v961_v60  ;;  %v953_v8 = vld [vmem:[%s1369_s25 + $0x10] sm:$0xf] }
  0x26   : > { %688 = vmatpush.bf16.msra.mxu0 %v978_v45  ;;  %v1089_v1 = vld [vmem:[%s1369_s25 + $0x120] sm:$0xf]  ;;  %v1242_v2 = vld [vmem:[%s1369_s25 + $0x124] sm:$0xf0]  ;;  %v1026_v6 = vor.u32 %v1226_v0, %v1025_v62  ;;  %v1208_v9 = vld [vmem:[%s1369_s25 + $0x14] sm:$0xf0] }
  0x27   : > { %701 = vmatpush.bf16.msra.mxu1 %v1042_v46  ;;  %v1153_v3 = vld [vmem:[%s1369_s25 + $0x1a0] sm:$0xf]  ;;  %v1258_v4 = vld [vmem:[%s1369_s25 + $0x1a4] sm:$0xf0]  ;;  %v1090_v7 = vor.u32 %v1242_v2, %v1089_v1  ;;  %v1017_v10 = vld [vmem:[%s1369_s25 + $0x90] sm:$0xf]  ;;  %v954_v17 = vor.u32 %v1208_v9, %v953_v8 }
  0x28   : > { %714 = vmatpush.bf16.msra.mxu2 %v1106_v47  ;;  %v1154_v11 = vor.u32 %v1258_v4, %v1153_v3  ;;  %v1224_v12 = vld [vmem:[%s1369_s25 + $0x94] sm:$0xf0]  ;;  %v1081_v13 = vld [vmem:[%s1369_s25 + $0x110] sm:$0xf]  ;;  %v945_v18 = vld [vmem:[%s1369_s25] sm:$0xf] }
  0x29   : > { %727 = vmatpush.bf16.msra.mxu3 %v1170_v51  ;;  %v1240_v14 = vld [vmem:[%s1369_s25 + $0x114] sm:$0xf0]  ;;  %v1145_v15 = vld [vmem:[%s1369_s25 + $0x190] sm:$0xf]  ;;  %v1206_v19 = vld [vmem:[%s1369_s25 + $0x4] sm:$0xf0]  ;;  %v1018_v21 = vor.u32 %v1224_v12, %v1017_v10 }
  0x2a   : > { %689 = vmatpush.bf16.msra.mxu0 %v970_v57  ;;  %v1256_v16 = vld [vmem:[%s1369_s25 + $0x194] sm:$0xf0]  ;;  %v1009_v20 = vld [vmem:[%s1369_s25 + $0x80] sm:$0xf]  ;;  %v1082_v22 = vor.u32 %v1240_v14, %v1081_v13  ;;  %v1222_v23 = vld [vmem:[%s1369_s25 + $0x84] sm:$0xf0]  ;;  %v946_v33 = vor.u32 %v1206_v19, %v945_v18 }
  0x2b   : > { %702 = vmatpush.bf16.msra.mxu1 %v1034_v58  ;;  %v1073_v24 = vld [vmem:[%s1369_s25 + $0x100] sm:$0xf]  ;;  %v1238_v25 = vld [vmem:[%s1369_s25 + $0x104] sm:$0xf0]  ;;  %v1146_v26 = vor.u32 %v1256_v16, %v1145_v15  ;;  %v1219_v29 = vld [vmem:[%s1369_s25 + $0x74] sm:$0xf]  ;;  %v1010_v38 = vor.u32 %v1222_v23, %v1009_v20 }
  0x2c   : > { %715 = vmatpush.bf16.msra.mxu2 %v1098_v59  ;;  %v1137_v27 = vld [vmem:[%s1369_s25 + $0x180] sm:$0xf]  ;;  %v1254_v28 = vld [vmem:[%s1369_s25 + $0x184] sm:$0xf0]  ;;  %v1003_v30 = vld [vmem:[%s1369_s25 + $0x78] sm:$0xf0]  ;;  %v1074_v39 = vor.u32 %v1238_v25, %v1073_v24 }
  0x2d   : > { %728 = vmatpush.bf16.msra.mxu3 %v1162_v63  ;;  %v1235_v31 = vld [vmem:[%s1369_s25 + $0xf4] sm:$0xf]  ;;  %v286_v32 = vld [vmem:[%s1364_s21 + $0x8] sm:$0xff]  ;;  %v1067_v34 = vld [vmem:[%s1369_s25 + $0xf8] sm:$0xf0]  ;;  %v1138_v43 = vor.u32 %v1254_v28, %v1137_v27  ;;  %v1006_v44 = vor.u32 %v1219_v29, %v1003_v30  ;;  %p1199_p7 = scmp.ne.s32.totalorder %s1308_s12, 3 }
  0x2e   : > { %690 = vmatpush.bf16.msra.mxu0 %v962_v5  ;;  %v1251_v35 = vld [vmem:[%s1369_s25 + $0x174] sm:$0xf]  ;;  %v1131_v36 = vld [vmem:[%s1369_s25 + $0x178] sm:$0xf0]  ;;  %v355_v37 = vunpack.c.l.b16 %v286_v32  ;;  %v356_v42 = vunpack.c.h.b16 %v286_v32  ;;  %v285_v45 = vld [vmem:[%s1364_s21] sm:$0xff]  ;;  %v1070_v46 = vor.u32 %v1235_v31, %v1067_v34 }
  0x2f   : > { %703 = vmatpush.bf16.msra.mxu1 %v1026_v6  ;;  %v1267_v40 = vld [vmem:[%s1369_s25 + $0x1f4] sm:$0xf]  ;;  %v1195_v41 = vld [vmem:[%s1369_s25 + $0x1f8] sm:$0xf0]  ;;  %v1134_v47 = vor.u32 %v1251_v35, %v1131_v36  ;;  %v1217_v48 = vld [vmem:[%s1369_s25 + $0x64] sm:$0xf]  ;;  %v353_v51 = vunpack.c.l.b16 %v285_v45  ;;  %v354_v52 = vunpack.c.h.b16 %v285_v45 }
  0x30   : > { %716 = vmatpush.bf16.msra.mxu2 %v1090_v7  ;;  %v995_v49 = vld [vmem:[%s1369_s25 + $0x68] sm:$0xf0]  ;;  %v1233_v50 = vld [vmem:[%s1369_s25 + $0xe4] sm:$0xf]  ;;  %v1198_v53 = vor.u32 %v1267_v40, %v1195_v41  ;;  %v1452_v57 = vpack.c.b16 %v355_v37, %v355_v37  ;;  %v1456_v60 = vpack.c.b16 %v356_v42, %v356_v42  ;;  %v1215_v2 = vld [vmem:[%s1369_s25 + $0x54] sm:$0xf] }
  0x31   : > { %729 = vmatpush.bf16.msra.mxu3 %v1154_v11  ;;  %v1059_v54 = vld [vmem:[%s1369_s25 + $0xe8] sm:$0xf0]  ;;  %v1249_v55 = vld [vmem:[%s1369_s25 + $0x164] sm:$0xf]  ;;  %v1458_v61 = vpack.c.b16 %v353_v51, %v353_v51  ;;  %v998_v62 = vor.u32 %v1217_v48, %v995_v49  ;;  %v1460_v63 = vpack.c.b16 %v354_v52, %v354_v52  ;;  %v987_v3 = vld [vmem:[%s1369_s25 + $0x58] sm:$0xf0] }
  0x32   : > { %691 = vmatpush.bf16.msra.mxu0 %v954_v17  ;;  %v1123_v56 = vld [vmem:[%s1369_s25 + $0x168] sm:$0xf0]  ;;  %v1265_v58 = vld [vmem:[%s1369_s25 + $0x1e4] sm:$0xf]  ;;  %v1062_v0 = vor.u32 %v1233_v50, %v1059_v54  ;;  %v1231_v4 = vld [vmem:[%s1369_s25 + $0xd4] sm:$0xf]  ;;  %v990_v11 = vor.u32 %v1215_v2, %v987_v3 }
  0x33   : > { %704 = vmatpush.bf16.msra.mxu1 %v1018_v21  ;;  %v1187_v59 = vld [vmem:[%s1369_s25 + $0x1e8] sm:$0xf0]  ;;  %v1126_v1 = vor.u32 %v1249_v55, %v1123_v56  ;;  %v1051_v6 = vld [vmem:[%s1369_s25 + $0xd8] sm:$0xf0]  ;;  %v1247_v7 = vld [vmem:[%s1369_s25 + $0x154] sm:$0xf] }
  0x34   : > { %717 = vmatpush.bf16.msra.mxu2 %v1082_v22  ;;  %v1190_v5 = vor.u32 %v1265_v58, %v1187_v59  ;;  %v1115_v8 = vld [vmem:[%s1369_s25 + $0x158] sm:$0xf0]  ;;  %v1263_v9 = vld [vmem:[%s1369_s25 + $0x1d4] sm:$0xf]  ;;  %v1054_v12 = vor.u32 %v1231_v4, %v1051_v6  ;;  %v1213_v14 = vld [vmem:[%s1369_s25 + $0x44] sm:$0xf] }
  0x35   : > { %730 = vmatpush.bf16.msra.mxu3 %v1146_v26  ;;  %v1179_v10 = vld [vmem:[%s1369_s25 + $0x1d8] sm:$0xf0]  ;;  %v1118_v13 = vor.u32 %v1247_v7, %v1115_v8  ;;  %v979_v15 = vld [vmem:[%s1369_s25 + $0x48] sm:$0xf0]  ;;  %v1229_v16 = vld [vmem:[%s1369_s25 + $0xc4] sm:$0xf] }
  0x36   : > { %692 = vmatpush.bf16.msra.mxu0 %v946_v33  ;;  %v1182_v17 = vor.u32 %v1263_v9, %v1179_v10  ;;  %v1043_v18 = vld [vmem:[%s1369_s25 + $0xc8] sm:$0xf0]  ;;  %v1245_v19 = vld [vmem:[%s1369_s25 + $0x144] sm:$0xf]  ;;  %v982_v23 = vor.u32 %v1213_v14, %v979_v15  ;;  %v1211_v26 = vld [vmem:[%s1369_s25 + $0x34] sm:$0xf] }
  0x37   : > { %705 = vmatpush.bf16.msra.mxu1 %v1010_v38  ;;  %v1107_v20 = vld [vmem:[%s1369_s25 + $0x148] sm:$0xf0]  ;;  %v1261_v21 = vld [vmem:[%s1369_s25 + $0x1c4] sm:$0xf]  ;;  %v1046_v24 = vor.u32 %v1229_v16, %v1043_v18  ;;  %v971_v27 = vld [vmem:[%s1369_s25 + $0x38] sm:$0xf0] }
  0x38   : > { %718 = vmatpush.bf16.msra.mxu2 %v1074_v39  ;;  %v1171_v22 = vld [vmem:[%s1369_s25 + $0x1c8] sm:$0xf0]  ;;  %v1110_v25 = vor.u32 %v1245_v19, %v1107_v20  ;;  %v1227_v28 = vld [vmem:[%s1369_s25 + $0xb4] sm:$0xf]  ;;  %v1035_v30 = vld [vmem:[%s1369_s25 + $0xb8] sm:$0xf0]  ;;  %v974_v35 = vor.u32 %v1211_v26, %v971_v27 }
  0x39   : > { %731 = vmatpush.bf16.msra.mxu3 %v1138_v43  ;;  %693 = vmatmul.bf16.vlgmr.msra.gmra.mxu0 %v1458_v61  ;;  %v1174_v29 = vor.u32 %v1261_v21, %v1171_v22  ;;  %v1243_v31 = vld [vmem:[%s1369_s25 + $0x134] sm:$0xf]  ;;  %v1099_v32 = vld [vmem:[%s1369_s25 + $0x138] sm:$0xf0]  ;;  %v1038_v36 = vor.u32 %v1227_v28, %v1035_v30  ;;  %v1209_v38 = vld [vmem:[%s1369_s25 + $0x24] sm:$0xf] }
  0x3a   : > { %737 = vmatpush.bf16.msrb.mxu0 %v1006_v44  ;;  %706 = vmatmul.bf16.vlgmr.msra.gmra.mxu1 %v1460_v63  ;;  %v1259_v33 = vld [vmem:[%s1369_s25 + $0x1b4] sm:$0xf]  ;;  %v1163_v34 = vld [vmem:[%s1369_s25 + $0x1b8] sm:$0xf0]  ;;  %v1102_v37 = vor.u32 %v1243_v31, %v1099_v32  ;;  %v963_v39 = vld [vmem:[%s1369_s25 + $0x28] sm:$0xf0] }
  0x3b   : > { %750 = vmatpush.bf16.msrb.mxu1 %v1070_v46  ;;  %719 = vmatmul.bf16.vlgmr.msra.gmra.mxu2 %v1452_v57  ;;  %v1225_v40 = vld [vmem:[%s1369_s25 + $0xa4] sm:$0xf]  ;;  %v1166_v41 = vor.u32 %v1259_v33, %v1163_v34  ;;  %v1027_v42 = vld [vmem:[%s1369_s25 + $0xa8] sm:$0xf0]  ;;  %v1207_v50 = vld [vmem:[%s1369_s25 + $0x14] sm:$0xf] }
  0x3c   : > { %763 = vmatpush.bf16.msrb.mxu2 %v1134_v47  ;;  %732 = vmatmul.bf16.vlgmr.msra.gmra.mxu3 %v1456_v60  ;;  %v1241_v43 = vld [vmem:[%s1369_s25 + $0x124] sm:$0xf]  ;;  %v1091_v44 = vld [vmem:[%s1369_s25 + $0x128] sm:$0xf0]  ;;  %v966_v47 = vor.u32 %v1209_v38, %v963_v39  ;;  %v1030_v48 = vor.u32 %v1225_v40, %v1027_v42  ;;  %v955_v51 = vld [vmem:[%s1369_s25 + $0x18] sm:$0xf0] }
  0x3d   : > { %776 = vmatpush.bf16.msrb.mxu3 %v1198_v53  ;;  %v1257_v45 = vld [vmem:[%s1369_s25 + $0x1a4] sm:$0xf]  ;;  %v1155_v46 = vld [vmem:[%s1369_s25 + $0x1a8] sm:$0xf0]  ;;  %v1094_v49 = vor.u32 %v1241_v43, %v1091_v44  ;;  %v1223_v52 = vld [vmem:[%s1369_s25 + $0x94] sm:$0xf] }
  0x3e   : > { %738 = vmatpush.bf16.msrb.mxu0 %v998_v62  ;;  %v1158_v53 = vor.u32 %v1257_v45, %v1155_v46  ;;  %v1019_v54 = vld [vmem:[%s1369_s25 + $0x98] sm:$0xf0]  ;;  %v1239_v55 = vld [vmem:[%s1369_s25 + $0x114] sm:$0xf]  ;;  %v958_v62 = vor.u32 %v1207_v50, %v955_v51  ;;  %v1205_v2 = vld [vmem:[%s1369_s25 + $0x4] sm:$0xf] }
  0x3f   : > { %751 = vmatpush.bf16.msrb.mxu1 %v1062_v0  ;;  %v1083_v56 = vld [vmem:[%s1369_s25 + $0x118] sm:$0xf0]  ;;  %v1255_v58 = vld [vmem:[%s1369_s25 + $0x194] sm:$0xf]  ;;  %v1022_v0 = vor.u32 %v1223_v52, %v1019_v54  ;;  %v947_v3 = vld [vmem:[%s1369_s25 + $0x8] sm:$0xf0] }
  0x40   : > { %764 = vmatpush.bf16.msrb.mxu2 %v1126_v1  ;;  %v1147_v59 = vld [vmem:[%s1369_s25 + $0x198] sm:$0xf0]  ;;  %v1086_v1 = vor.u32 %v1239_v55, %v1083_v56  ;;  %v1221_v4 = vld [vmem:[%s1369_s25 + $0x84] sm:$0xf]  ;;  %v1011_v6 = vld [vmem:[%s1369_s25 + $0x88] sm:$0xf0] }
  0x41   : > { %777 = vmatpush.bf16.msrb.mxu3 %v1190_v5  ;;  %v1150_v5 = vor.u32 %v1255_v58, %v1147_v59  ;;  %v1237_v7 = vld [vmem:[%s1369_s25 + $0x104] sm:$0xf]  ;;  %v1075_v8 = vld [vmem:[%s1369_s25 + $0x108] sm:$0xf0] }
  0x42   : > { %739 = vmatpush.bf16.msrb.mxu0 %v990_v11  ;;  %v1253_v9 = vld [vmem:[%s1369_s25 + $0x184] sm:$0xf]  ;;  %v1139_v10 = vld [vmem:[%s1369_s25 + $0x188] sm:$0xf0]  ;;  %v950_v11 = vor.u32 %v1205_v2, %v947_v3 }
  0x43   : > { %752 = vmatpush.bf16.msrb.mxu1 %v1054_v12  ;;  %v1014_v12 = vor.u32 %v1221_v4, %v1011_v6  ;;  %v1142_v14 = vor.u32 %v1253_v9, %v1139_v10  ;;  %v283_v21 = vld [vmem:[#allocation2] sm:$0xff]  ;;  %v284_v31 = vld [vmem:[#allocation2 + $0x8] sm:$0xff] }
  0x44   : > { %765 = vmatpush.bf16.msrb.mxu2 %v1118_v13  ;;  %v1078_v13 = vor.u32 %v1237_v7, %v1075_v8 }
  0x45   : > { %778 = vmatpush.bf16.msrb.mxu3 %v1182_v17 }
  0x46   : > { %740 = vmatpush.bf16.msrb.mxu0 %v982_v23 }
  0x47   : > { %753 = vmatpush.bf16.msrb.mxu1 %v1046_v24 }
  0x48   : > { %766 = vmatpush.bf16.msrb.mxu2 %v1110_v25 }
  0x49   : > { %779 = vmatpush.bf16.msrb.mxu3 %v1174_v29 }
  0x4a   : > { %741 = vmatpush.bf16.msrb.mxu0 %v974_v35 }
  0x4b   : > { %754 = vmatpush.bf16.msrb.mxu1 %v1038_v36 }
  0x4c   : > { %767 = vmatpush.bf16.msrb.mxu2 %v1102_v37 }
  0x4d   : > { %780 = vmatpush.bf16.msrb.mxu3 %v1166_v41 }
  0x4e   : > { %742 = vmatpush.bf16.msrb.mxu0 %v966_v47 }
  0x4f   : > { %755 = vmatpush.bf16.msrb.mxu1 %v1030_v48 }
  0x50   : > { %768 = vmatpush.bf16.msrb.mxu2 %v1094_v49 }
  0x51   : > { %781 = vmatpush.bf16.msrb.mxu3 %v1158_v53 }
  0x52   : > { %743 = vmatpush.bf16.msrb.mxu0 %v958_v62 }
  0x53   : > { %756 = vmatpush.bf16.msrb.mxu1 %v1022_v0 }
  0x54   : > { %769 = vmatpush.bf16.msrb.mxu2 %v1086_v1 }
  0x55   : > { %782 = vmatpush.bf16.msrb.mxu3 %v1150_v5 }
  0x56   : > { %744 = vmatpush.bf16.msrb.mxu0 %v950_v11 }
  0x57   : > { %757 = vmatpush.bf16.msrb.mxu1 %v1014_v12 }
  0x58   : > { %770 = vmatpush.bf16.msrb.mxu2 %v1078_v13 }
  0x59   : > { %783 = vmatpush.bf16.msrb.mxu3 %v1142_v14  ;;  %745 = vmatmul.bf16.vlgmr.msrb.gmra.mxu0 %v1458_v61 }
  0x5a   : > { %758 = vmatmul.bf16.vlgmr.msrb.gmra.mxu1 %v1460_v63 }
  0x5b   : > { %771 = vmatmul.bf16.vlgmr.msrb.gmra.mxu2 %v1452_v57 }
  0x5c   : > { %784 = vmatmul.bf16.vlgmr.msrb.gmra.mxu3 %v1456_v60 }
  0xb6   : > { %v694_v15 = vpop.f32.mrf.mxu0 }
  0xb7   : > { %v707_v16 = vpop.f32.mrf.mxu1 }
  0xb8   : > { %v708_v17 = vadd.f32 %v707_v16, %v694_v15 }
  0xbe   : > { %v720_v18 = vpop.f32.mrf.mxu2  ;;  %v696_v23 = vpop.f32.mrf.mxu0 }
  0xbf   : > { %v721_v19 = vadd.f32 %v720_v18, %v708_v17  ;;  %v733_v20 = vpop.f32.mrf.mxu3  ;;  %v709_v24 = vpop.f32.mrf.mxu1 }
  0xc1   : > { %v734_v22 = vadd.f32 %v733_v20, %v721_v19 }
  0xc3   : > { %v789_v25 = vadd.f32 %v734_v22, %v283_v21 }
  0xc5   : > { %791 = vst [vmem:[#allocation2] sm:$0xff] %v789_v25 }
  0xc6   : > { %v722_v26 = vpop.f32.mrf.mxu2 }
  0xc7   : > { %v735_v61 = vpop.f32.mrf.mxu3 }
  0xd6   : > { %v746_v27 = vpop.f32.mrf.mxu0 }
  0xd7   : > { %v759_v63 = vpop.f32.mrf.mxu1 }
  0xd8   : > { %v760_v28 = vadd.f32 %v759_v63, %v746_v27 }
  0xde   : > { %v772_v57 = vpop.f32.mrf.mxu2  ;;  %v748_v30 = vpop.f32.mrf.mxu0 }
  0xdf   : > { %v773_v29 = vadd.f32 %v772_v57, %v760_v28  ;;  %v785_v60 = vpop.f32.mrf.mxu3  ;;  %v761_v32 = vpop.f32.mrf.mxu1 }
  0xe1   : > { %v786_v33 = vadd.f32 %v785_v60, %v773_v29 }
  0xe3   : > { %v790_v34 = vadd.f32 %v786_v33, %v284_v31  ;;  %796 = sbr.rel (%p1199_p7) target bundleno = 245 (0xf5), region = 40 }
  0xe5   : > { %792 = vst [vmem:[#allocation2 + $0x8] sm:$0xff] %v790_v34 }
  0xe6   : > { %v774_v35 = vpop.f32.mrf.mxu2 }
  0xe7   : > { %v787_v36 = vpop.f32.mrf.mxu3 }
  0xe8   : > { %v797_v37 = vld [vmem:[#allocation2] sm:$0xff] }
  0xe9   : > { %v799_v39 = vld [vmem:[%s1536_s2] sm:$0x3] }
  0xea   : > { %v801_v40 = vperm.slane %v799_v39, 0  ;;  %v802_v41 = vperm.slane %v799_v39, 1 }
  0xec   : > { %v798_v38 = vld [vmem:[#allocation2 + $0x8] sm:$0xff]  ;;  %v805_v42 = vadd.f32 %v801_v40, %v797_v37 }
  0xed   : > { %v806_v43 = vadd.f32 %v802_v41, %v798_v38 }
  0xee   : > { %vm807_vm0 = vcmp.gt.f32.partialorder %v805_v42, 0.0  ;;  %v809_v44 = vmul.f32 0.2, %v805_v42 }
  0xef   : > { %vm808_vm1 = vcmp.gt.f32.partialorder %v806_v43, 0.0  ;;  %v810_v45 = vmul.f32 0.2, %v806_v43 }
  0xf0   : > { %v811_v46 = vsel %vm807_vm0, %v805_v42, %v809_v44 }
  0xf1   : > { %v812_v47 = vsel %vm808_vm1, %v806_v43, %v810_v45 }
  0xf2   : > { %v813_v48 = vpack.c.bf16 %v812_v47, %v811_v46 }
  0xf4   : > { %814 = vst [vmem:[%s1537_s3] sm:$0xff] %v813_v48 }
  0xf5 PF: > { %s13_s14 = sadd.s32 1, %s1316_s14   ;;  %s1538_s12 = smov %s1312_s13 }
  0xf6   : > { %p10_p8 = scmp.ge.s32.totalorder %s13_s14, 6   ;;  %s1539_s13 = smov %s1541_s15 }
  0xf8   :  { %12 = sbr.rel (!%p10_p8) target bundleno = 2 (0x2), region = 76 }

// kernel: highres_discriminator_forward.9
= control target key start
LH: loop header
LB: loop body
LE: loop exit
PB: predicated region body
PF: predicated region fallthrough
CT: control target
= control target key end

     0   :  { %s1929_s1 = inlined_call_operand.vmem [shape: bf16[256,512], index: 1, kind: input, shape index: {}]   ;;  %s1930_s0 = inlined_call_operand.vmem [shape: bf16[8,256], index: 0, kind: input, shape index: {}]   ;;  %s1931_s3 = inlined_call_operand.vmem [shape: bf16[512,128], index: 3, kind: input, shape index: {}]   ;;  %s1932_s4 = inlined_call_operand.vmem [shape: f32[1,128], index: 4, kind: input, shape index: {}]   ;;  %s1933_s2 = inlined_call_operand.vmem [shape: f32[1,512], index: 2, kind: input, shape index: {}]   ;;  %s1934_s5 = inlined_call_operand.vmem [shape: f32[8,128], index: 5, kind: output, shape index: {}]  }
   0x1   :  { %v1023_v0 = vld [vmem:[%s1929_s1 + $0xe0] sm:$0xf]  ;;  %v1324_v1 = vld [vmem:[%s1929_s1 + $0xec] sm:$0xf0]  ;;  %v1322_v5 = vld [vmem:[%s1929_s1 + $0xe4] sm:$0xf] }
   0x2   :  { %v1151_v2 = vld [vmem:[%s1929_s1 + $0x1e0] sm:$0xf]  ;;  %v1024_v3 = vor.u32 %v1324_v1, %v1023_v0  ;;  %v1356_v4 = vld [vmem:[%s1929_s1 + $0x1ec] sm:$0xf0]  ;;  %v1025_v6 = vld [vmem:[%s1929_s1 + $0xf0] sm:$0xf0] }
   0x3   :  { %v1152_v7 = vor.u32 %v1356_v4, %v1151_v2  ;;  %v1028_v8 = vor.u32 %v1322_v5, %v1025_v6  ;;  %v1354_v9 = vld [vmem:[%s1929_s1 + $0x1e4] sm:$0xf]  ;;  %v1153_v10 = vld [vmem:[%s1929_s1 + $0x1f0] sm:$0xf0]  ;;  %v1007_v11 = vld [vmem:[%s1929_s1 + $0xc0] sm:$0xf] }
   0x4   :  { %424 = vmatpush.bf16.msra.mxu0 %v1024_v3  ;;  %v1156_v12 = vor.u32 %v1354_v9, %v1153_v10  ;;  %v1320_v13 = vld [vmem:[%s1929_s1 + $0xcc] sm:$0xf0]  ;;  %v1135_v14 = vld [vmem:[%s1929_s1 + $0x1c0] sm:$0xf]  ;;  %v1318_v18 = vld [vmem:[%s1929_s1 + $0xc4] sm:$0xf] }
   0x5   :  { %v1352_v15 = vld [vmem:[%s1929_s1 + $0x1cc] sm:$0xf0]  ;;  %437 = vmatpush.bf16.msra.mxu1 %v1152_v7  ;;  %450 = vmatpush.bf16.msra.mxu2 %v1028_v8  ;;  %v1008_v16 = vor.u32 %v1320_v13, %v1007_v11  ;;  %v1009_v19 = vld [vmem:[%s1929_s1 + $0xd0] sm:$0xf0]  ;;  %v1350_v20 = vld [vmem:[%s1929_s1 + $0x1c4] sm:$0xf] }
   0x6   :  { %v1136_v17 = vor.u32 %v1352_v15, %v1135_v14  ;;  %463 = vmatpush.bf16.msra.mxu3 %v1156_v12  ;;  %v1012_v21 = vor.u32 %v1318_v18, %v1009_v19  ;;  %v1137_v22 = vld [vmem:[%s1929_s1 + $0x1d0] sm:$0xf0]  ;;  %v991_v23 = vld [vmem:[%s1929_s1 + $0xa0] sm:$0xf]  ;;  %v1316_v24 = vld [vmem:[%s1929_s1 + $0xac] sm:$0xf0] }
   0x7   :  { %v1140_v25 = vor.u32 %v1350_v20, %v1137_v22  ;;  %v1119_v26 = vld [vmem:[%s1929_s1 + $0x1a0] sm:$0xf]  ;;  %v1348_v27 = vld [vmem:[%s1929_s1 + $0x1ac] sm:$0xf0]  ;;  %v1314_v28 = vld [vmem:[%s1929_s1 + $0xa4] sm:$0xf]  ;;  %v992_v29 = vor.u32 %v1316_v24, %v991_v23 }
   0x8   :  { %425 = vmatpush.bf16.msra.mxu0 %v1008_v16  ;;  %v993_v30 = vld [vmem:[%s1929_s1 + $0xb0] sm:$0xf0]  ;;  %v1346_v31 = vld [vmem:[%s1929_s1 + $0x1a4] sm:$0xf]  ;;  %v1120_v33 = vor.u32 %v1348_v27, %v1119_v26  ;;  %v975_v35 = vld [vmem:[%s1929_s1 + $0x80] sm:$0xf] }
   0x9   :  { %v1121_v32 = vld [vmem:[%s1929_s1 + $0x1b0] sm:$0xf0]  ;;  %438 = vmatpush.bf16.msra.mxu1 %v1136_v17  ;;  %451 = vmatpush.bf16.msra.mxu2 %v1012_v21  ;;  %v996_v34 = vor.u32 %v1314_v28, %v993_v30  ;;  %v1312_v36 = vld [vmem:[%s1929_s1 + $0x8c] sm:$0xf0]  ;;  %v1103_v37 = vld [vmem:[%s1929_s1 + $0x180] sm:$0xf] }
   0xa   :  { %464 = vmatpush.bf16.msra.mxu3 %v1140_v25  ;;  %v1124_v38 = vor.u32 %v1346_v31, %v1121_v32  ;;  %v1344_v39 = vld [vmem:[%s1929_s1 + $0x18c] sm:$0xf0]  ;;  %v1310_v40 = vld [vmem:[%s1929_s1 + $0x84] sm:$0xf]  ;;  %v977_v41 = vld [vmem:[%s1929_s1 + $0x90] sm:$0xf0]  ;;  %v976_v44 = vor.u32 %v1312_v36, %v975_v35 }
   0xb   :  { %v1342_v42 = vld [vmem:[%s1929_s1 + $0x184] sm:$0xf]  ;;  %v1105_v43 = vld [vmem:[%s1929_s1 + $0x190] sm:$0xf0]  ;;  %v1104_v45 = vor.u32 %v1344_v39, %v1103_v37  ;;  %v980_v46 = vor.u32 %v1310_v40, %v977_v41  ;;  %v959_v47 = vld [vmem:[%s1929_s1 + $0x60] sm:$0xf] }
   0xc   :  { %426 = vmatpush.bf16.msra.mxu0 %v992_v29  ;;  %v1308_v48 = vld [vmem:[%s1929_s1 + $0x6c] sm:$0xf0]  ;;  %v1087_v49 = vld [vmem:[%s1929_s1 + $0x160] sm:$0xf]  ;;  %v1108_v50 = vor.u32 %v1342_v42, %v1105_v43  ;;  %v1306_v52 = vld [vmem:[%s1929_s1 + $0x64] sm:$0xf] }
   0xd   :  { %439 = vmatpush.bf16.msra.mxu1 %v1120_v33  ;;  %452 = vmatpush.bf16.msra.mxu2 %v996_v34  ;;  %v1340_v51 = vld [vmem:[%s1929_s1 + $0x16c] sm:$0xf0]  ;;  %v961_v53 = vld [vmem:[%s1929_s1 + $0x70] sm:$0xf0]  ;;  %v1338_v54 = vld [vmem:[%s1929_s1 + $0x164] sm:$0xf]  ;;  %v960_v56 = vor.u32 %v1308_v48, %v959_v47 }
   0xe   :  { %465 = vmatpush.bf16.msra.mxu3 %v1124_v38  ;;  %v1089_v55 = vld [vmem:[%s1929_s1 + $0x170] sm:$0xf0]  ;;  %v1088_v57 = vor.u32 %v1340_v51, %v1087_v49  ;;  %v964_v58 = vor.u32 %v1306_v52, %v961_v53  ;;  %v943_v59 = vld [vmem:[%s1929_s1 + $0x40] sm:$0xf]  ;;  %v1304_v60 = vld [vmem:[%s1929_s1 + $0x4c] sm:$0xf0] }
   0xf   :  { %v1071_v61 = vld [vmem:[%s1929_s1 + $0x140] sm:$0xf]  ;;  %v1092_v62 = vor.u32 %v1338_v54, %v1089_v55  ;;  %v1336_v63 = vld [vmem:[%s1929_s1 + $0x14c] sm:$0xf0]  ;;  %v1302_v0 = vld [vmem:[%s1929_s1 + $0x44] sm:$0xf]  ;;  %v944_v4 = vor.u32 %v1304_v60, %v943_v59 }
  0x10   :  { %427 = vmatpush.bf16.msra.mxu0 %v976_v44  ;;  %v945_v1 = vld [vmem:[%s1929_s1 + $0x50] sm:$0xf0]  ;;  %v1334_v2 = vld [vmem:[%s1929_s1 + $0x144] sm:$0xf]  ;;  %v1072_v5 = vor.u32 %v1336_v63, %v1071_v61  ;;  %v927_v7 = vld [vmem:[%s1929_s1 + $0x20] sm:$0xf] }
  0x11   :  { %440 = vmatpush.bf16.msra.mxu1 %v1104_v45  ;;  %453 = vmatpush.bf16.msra.mxu2 %v980_v46  ;;  %v1073_v3 = vld [vmem:[%s1929_s1 + $0x150] sm:$0xf0]  ;;  %v948_v6 = vor.u32 %v1302_v0, %v945_v1  ;;  %v1300_v8 = vld [vmem:[%s1929_s1 + $0x2c] sm:$0xf0]  ;;  %v1055_v9 = vld [vmem:[%s1929_s1 + $0x120] sm:$0xf] }
  0x12   :  { %466 = vmatpush.bf16.msra.mxu3 %v1108_v50  ;;  %v1076_v10 = vor.u32 %v1334_v2, %v1073_v3  ;;  %v1332_v11 = vld [vmem:[%s1929_s1 + $0x12c] sm:$0xf0]  ;;  %v1298_v12 = vld [vmem:[%s1929_s1 + $0x24] sm:$0xf]  ;;  %v929_v13 = vld [vmem:[%s1929_s1 + $0x30] sm:$0xf0]  ;;  %v928_v16 = vor.u32 %v1300_v8, %v927_v7 }
  0x13   :  { %v1330_v14 = vld [vmem:[%s1929_s1 + $0x124] sm:$0xf]  ;;  %v1057_v15 = vld [vmem:[%s1929_s1 + $0x130] sm:$0xf0]  ;;  %v911_v17 = vld [vmem:[%s1929_s1] sm:$0xf]  ;;  %v1056_v20 = vor.u32 %v1332_v11, %v1055_v9  ;;  %v932_v21 = vor.u32 %v1298_v12, %v929_v13 }
  0x14   :  { %428 = vmatpush.bf16.msra.mxu0 %v960_v56  ;;  %v1296_v18 = vld [vmem:[%s1929_s1 + $0xc] sm:$0xf0]  ;;  %v1039_v19 = vld [vmem:[%s1929_s1 + $0x100] sm:$0xf]  ;;  %v1294_v23 = vld [vmem:[%s1929_s1 + $0x4] sm:$0xf]  ;;  %v1060_v25 = vor.u32 %v1330_v14, %v1057_v15 }
  0x15   :  { %441 = vmatpush.bf16.msra.mxu1 %v1088_v57  ;;  %454 = vmatpush.bf16.msra.mxu2 %v964_v58  ;;  %v1328_v22 = vld [vmem:[%s1929_s1 + $0x10c] sm:$0xf0]  ;;  %v913_v24 = vld [vmem:[%s1929_s1 + $0x10] sm:$0xf0]  ;;  %v1326_v26 = vld [vmem:[%s1929_s1 + $0x104] sm:$0xf]  ;;  %v912_v32 = vor.u32 %v1296_v18, %v911_v17 }
  0x16   :  { %467 = vmatpush.bf16.msra.mxu3 %v1092_v62  ;;  %v1041_v27 = vld [vmem:[%s1929_s1 + $0x110] sm:$0xf0]  ;;  %v1031_v28 = vld [vmem:[%s1929_s1 + $0xe8] sm:$0xf]  ;;  %v1325_v29 = vld [vmem:[%s1929_s1 + $0xf4] sm:$0xf0]  ;;  %v1040_v37 = vor.u32 %v1328_v22, %v1039_v19  ;;  %v916_v38 = vor.u32 %v1294_v23, %v913_v24 }
  0x17   :  { %v1159_v30 = vld [vmem:[%s1929_s1 + $0x1e8] sm:$0xf]  ;;  %v32_v31 = vld [vmem:[%s1930_s0] sm:$0xff]  ;;  %v1357_v33 = vld [vmem:[%s1929_s1 + $0x1f4] sm:$0xf0]  ;;  %v1044_v42 = vor.u32 %v1326_v26, %v1041_v27  ;;  %v1032_v43 = vor.u32 %v1325_v29, %v1031_v28 }
  0x18   :  { %429 = vmatpush.bf16.msra.mxu0 %v944_v4  ;;  %v1323_v34 = vld [vmem:[%s1929_s1 + $0xec] sm:$0xf]  ;;  %v1033_v35 = vld [vmem:[%s1929_s1 + $0xf8] sm:$0xf0]  ;;  %v98_v36 = vunpack.c.l.b16 %v32_v31  ;;  %v99_v41 = vunpack.c.h.b16 %v32_v31  ;;  %v1160_v44 = vor.u32 %v1357_v33, %v1159_v30  ;;  %v1015_v46 = vld [vmem:[%s1929_s1 + $0xc8] sm:$0xf] }
  0x19   :  { %442 = vmatpush.bf16.msra.mxu1 %v1072_v5  ;;  %455 = vmatpush.bf16.msra.mxu2 %v948_v6  ;;  %v1355_v39 = vld [vmem:[%s1929_s1 + $0x1ec] sm:$0xf]  ;;  %v1161_v40 = vld [vmem:[%s1929_s1 + $0x1f8] sm:$0xf0]  ;;  %v1036_v45 = vor.u32 %v1323_v34, %v1033_v35  ;;  %v1321_v47 = vld [vmem:[%s1929_s1 + $0xd4] sm:$0xf0] }
  0x1a   :  { %468 = vmatpush.bf16.msra.mxu3 %v1076_v10  ;;  %v1143_v48 = vld [vmem:[%s1929_s1 + $0x1c8] sm:$0xf]  ;;  %v1164_v49 = vor.u32 %v1355_v39, %v1161_v40  ;;  %v1353_v50 = vld [vmem:[%s1929_s1 + $0x1d4] sm:$0xf0]  ;;  %v1319_v51 = vld [vmem:[%s1929_s1 + $0xcc] sm:$0xf]  ;;  %v1662_v53 = vpack.c.b16 %v98_v36, %v98_v36  ;;  %v1670_v56 = vpack.c.b16 %v99_v41, %v99_v41  ;;  %v1016_v57 = vor.u32 %v1321_v47, %v1015_v46 }
  0x1b   :  { %v1017_v52 = vld [vmem:[%s1929_s1 + $0xd8] sm:$0xf0]  ;;  %v1351_v54 = vld [vmem:[%s1929_s1 + $0x1cc] sm:$0xf]  ;;  %v1144_v58 = vor.u32 %v1353_v50, %v1143_v48  ;;  %v999_v60 = vld [vmem:[%s1929_s1 + $0xa8] sm:$0xf] }
  0x1c   :  { %430 = vmatpush.bf16.msra.mxu0 %v928_v16  ;;  %v1145_v55 = vld [vmem:[%s1929_s1 + $0x1d8] sm:$0xf0]  ;;  %v1020_v59 = vor.u32 %v1319_v51, %v1017_v52  ;;  %v1317_v61 = vld [vmem:[%s1929_s1 + $0xb4] sm:$0xf0]  ;;  %v1127_v62 = vld [vmem:[%s1929_s1 + $0x1a8] sm:$0xf] }
  0x1d   :  { %443 = vmatpush.bf16.msra.mxu1 %v1056_v20  ;;  %456 = vmatpush.bf16.msra.mxu2 %v932_v21  ;;  %v1148_v63 = vor.u32 %v1351_v54, %v1145_v55  ;;  %v1349_v0 = vld [vmem:[%s1929_s1 + $0x1b4] sm:$0xf0]  ;;  %v1315_v1 = vld [vmem:[%s1929_s1 + $0xac] sm:$0xf]  ;;  %v1001_v2 = vld [vmem:[%s1929_s1 + $0xb8] sm:$0xf0]  ;;  %v1000_v5 = vor.u32 %v1317_v61, %v999_v60 }
  0x1e   :  { %469 = vmatpush.bf16.msra.mxu3 %v1060_v25  ;;  %v1347_v3 = vld [vmem:[%s1929_s1 + $0x1ac] sm:$0xf]  ;;  %v1129_v4 = vld [vmem:[%s1929_s1 + $0x1b8] sm:$0xf0]  ;;  %v1128_v6 = vor.u32 %v1349_v0, %v1127_v62  ;;  %v1004_v7 = vor.u32 %v1315_v1, %v1001_v2  ;;  %v983_v8 = vld [vmem:[%s1929_s1 + $0x88] sm:$0xf] }
  0x1f   :  { %v1313_v9 = vld [vmem:[%s1929_s1 + $0x94] sm:$0xf0]  ;;  %v1111_v10 = vld [vmem:[%s1929_s1 + $0x188] sm:$0xf]  ;;  %v1132_v11 = vor.u32 %v1347_v3, %v1129_v4  ;;  %v1311_v13 = vld [vmem:[%s1929_s1 + $0x8c] sm:$0xf] }
  0x20   :  { %431 = vmatpush.bf16.msra.mxu0 %v912_v32  ;;  %v1345_v12 = vld [vmem:[%s1929_s1 + $0x194] sm:$0xf0]  ;;  %v985_v14 = vld [vmem:[%s1929_s1 + $0x98] sm:$0xf0]  ;;  %v1343_v15 = vld [vmem:[%s1929_s1 + $0x18c] sm:$0xf]  ;;  %v984_v17 = vor.u32 %v1313_v9, %v983_v8 }
  0x21   :  { %444 = vmatpush.bf16.msra.mxu1 %v1040_v37  ;;  %457 = vmatpush.bf16.msra.mxu2 %v916_v38  ;;  %v1113_v16 = vld [vmem:[%s1929_s1 + $0x198] sm:$0xf0]  ;;  %v1112_v18 = vor.u32 %v1345_v12, %v1111_v10  ;;  %v988_v19 = vor.u32 %v1311_v13, %v985_v14  ;;  %v967_v20 = vld [vmem:[%s1929_s1 + $0x68] sm:$0xf]  ;;  %v1309_v21 = vld [vmem:[%s1929_s1 + $0x74] sm:$0xf0] }
  0x22   :  { %470 = vmatpush.bf16.msra.mxu3 %v1044_v42  ;;  %v1095_v22 = vld [vmem:[%s1929_s1 + $0x168] sm:$0xf]  ;;  %v1116_v23 = vor.u32 %v1343_v15, %v1113_v16  ;;  %v1341_v24 = vld [vmem:[%s1929_s1 + $0x174] sm:$0xf0]  ;;  %v1307_v25 = vld [vmem:[%s1929_s1 + $0x6c] sm:$0xf]  ;;  %v968_v29 = vor.u32 %v1309_v21, %v967_v20 }
  0x23   :  { %432 = vmatmul.bf16.vlgmr.msra.gmra.mxu0 %v1662_v53  ;;  %v969_v26 = vld [vmem:[%s1929_s1 + $0x78] sm:$0xf0]  ;;  %v1339_v27 = vld [vmem:[%s1929_s1 + $0x16c] sm:$0xf]  ;;  %v1096_v30 = vor.u32 %v1341_v24, %v1095_v22  ;;  %v951_v32 = vld [vmem:[%s1929_s1 + $0x48] sm:$0xf] }
  0x24   :  { %476 = vmatpush.bf16.msrb.mxu0 %v1032_v43  ;;  %458 = vmatmul.bf16.vlgmr.msra.gmra.mxu2 %v1662_v53  ;;  %v1097_v28 = vld [vmem:[%s1929_s1 + $0x178] sm:$0xf0]  ;;  %v972_v31 = vor.u32 %v1307_v25, %v969_v26  ;;  %v1305_v33 = vld [vmem:[%s1929_s1 + $0x54] sm:$0xf0]  ;;  %v1079_v34 = vld [vmem:[%s1929_s1 + $0x148] sm:$0xf] }
  0x25   :  { %489 = vmatpush.bf16.msrb.mxu1 %v1160_v44  ;;  %502 = vmatpush.bf16.msrb.mxu2 %v1036_v45  ;;  %v1100_v35 = vor.u32 %v1339_v27, %v1097_v28  ;;  %v1337_v36 = vld [vmem:[%s1929_s1 + $0x154] sm:$0xf0]  ;;  %v1303_v37 = vld [vmem:[%s1929_s1 + $0x4c] sm:$0xf]  ;;  %v953_v38 = vld [vmem:[%s1929_s1 + $0x58] sm:$0xf0]  ;;  %v952_v41 = vor.u32 %v1305_v33, %v951_v32 }
  0x26   :  { %515 = vmatpush.bf16.msrb.mxu3 %v1164_v49  ;;  %445 = vmatmul.bf16.vlgmr.msra.gmra.mxu1 %v1670_v56  ;;  %v1335_v39 = vld [vmem:[%s1929_s1 + $0x14c] sm:$0xf]  ;;  %v1081_v40 = vld [vmem:[%s1929_s1 + $0x158] sm:$0xf0]  ;;  %v1080_v42 = vor.u32 %v1337_v36, %v1079_v34  ;;  %v956_v43 = vor.u32 %v1303_v37, %v953_v38  ;;  %v935_v44 = vld [vmem:[%s1929_s1 + $0x28] sm:$0xf] }
  0x27   :  { %471 = vmatmul.bf16.vlgmr.msra.gmra.mxu3 %v1670_v56  ;;  %v1301_v45 = vld [vmem:[%s1929_s1 + $0x34] sm:$0xf0]  ;;  %v1063_v46 = vld [vmem:[%s1929_s1 + $0x128] sm:$0xf]  ;;  %v1084_v47 = vor.u32 %v1335_v39, %v1081_v40  ;;  %v1299_v49 = vld [vmem:[%s1929_s1 + $0x2c] sm:$0xf] }
  0x28   :  { %477 = vmatpush.bf16.msrb.mxu0 %v1016_v57  ;;  %v1333_v48 = vld [vmem:[%s1929_s1 + $0x134] sm:$0xf0]  ;;  %v937_v50 = vld [vmem:[%s1929_s1 + $0x38] sm:$0xf0]  ;;  %v1331_v51 = vld [vmem:[%s1929_s1 + $0x12c] sm:$0xf]  ;;  %v936_v54 = vor.u32 %v1301_v45, %v935_v44 }
  0x29   :  { %490 = vmatpush.bf16.msrb.mxu1 %v1144_v58  ;;  %503 = vmatpush.bf16.msrb.mxu2 %v1020_v59  ;;  %v1065_v52 = vld [vmem:[%s1929_s1 + $0x138] sm:$0xf0]  ;;  %v1064_v55 = vor.u32 %v1333_v48, %v1063_v46  ;;  %v940_v57 = vor.u32 %v1299_v49, %v937_v50  ;;  %v919_v58 = vld [vmem:[%s1929_s1 + $0x8] sm:$0xf]  ;;  %v1297_v59 = vld [vmem:[%s1929_s1 + $0x14] sm:$0xf0] }
  0x2a   :  { %516 = vmatpush.bf16.msrb.mxu3 %v1148_v63  ;;  %v1047_v60 = vld [vmem:[%s1929_s1 + $0x108] sm:$0xf]  ;;  %v1068_v61 = vor.u32 %v1331_v51, %v1065_v52  ;;  %v1329_v62 = vld [vmem:[%s1929_s1 + $0x114] sm:$0xf0]  ;;  %v1295_v63 = vld [vmem:[%s1929_s1 + $0xc] sm:$0xf]  ;;  %v920_v3 = vor.u32 %v1297_v59, %v919_v58 }
  0x2b   :  { %v921_v0 = vld [vmem:[%s1929_s1 + $0x18] sm:$0xf0]  ;;  %v1327_v1 = vld [vmem:[%s1929_s1 + $0x10c] sm:$0xf]  ;;  %v1048_v4 = vor.u32 %v1329_v62, %v1047_v60  ;;  %v1364_v9 = vld [vmem:[%s1931_s3 + $0x30] sm:$0xff] }
  0x2c   :  { %478 = vmatpush.bf16.msrb.mxu0 %v1000_v5  ;;  %v1049_v2 = vld [vmem:[%s1929_s1 + $0x118] sm:$0xf0]  ;;  %v924_v5 = vor.u32 %v1295_v63, %v921_v0  ;;  %v1372_v10 = vld [vmem:[%s1931_s3 + $0x70] sm:$0xff]  ;;  %v1371_v12 = vld [vmem:[%s1931_s3 + $0x68] sm:$0xff] }
  0x2d   :  { %491 = vmatpush.bf16.msrb.mxu1 %v1128_v6  ;;  %504 = vmatpush.bf16.msrb.mxu2 %v1004_v7  ;;  %v1052_v6 = vor.u32 %v1327_v1, %v1049_v2  ;;  %v1365_v7 = vld [vmem:[%s1931_s3 + $0x38] sm:$0xff]  ;;  %v1362_v13 = vld [vmem:[%s1931_s3 + $0x20] sm:$0xff]  ;;  %v1360_v15 = vld [vmem:[%s1931_s3 + $0x10] sm:$0xff] }
  0x2e   :  { %517 = vmatpush.bf16.msrb.mxu3 %v1132_v11  ;;  %v1373_v8 = vld [vmem:[%s1931_s3 + $0x78] sm:$0xff]  ;;  %v1363_v11 = vld [vmem:[%s1931_s3 + $0x28] sm:$0xff]  ;;  %v1368_v16 = vld [vmem:[%s1931_s3 + $0x50] sm:$0xff] }
  0x2f   :  { %v1369_v14 = vld [vmem:[%s1931_s3 + $0x58] sm:$0xff]  ;;  %v1380_v20 = vld [vmem:[%s1931_s3 + $0xb0] sm:$0xff]  ;;  %v1358_v21 = vld [vmem:[%s1931_s3] sm:$0xff] }
  0x30   :  { %479 = vmatpush.bf16.msrb.mxu0 %v984_v17  ;;  %v1381_v17 = vld [vmem:[%s1931_s3 + $0xb8] sm:$0xff]  ;;  %v1379_v24 = vld [vmem:[%s1931_s3 + $0xa8] sm:$0xff]  ;;  %v1388_v25 = vld [vmem:[%s1931_s3 + $0xf0] sm:$0xff] }
  0x31   :  { %492 = vmatpush.bf16.msrb.mxu1 %v1112_v18  ;;  %505 = vmatpush.bf16.msrb.mxu2 %v988_v19  ;;  %v1359_v18 = vld [vmem:[%s1931_s3 + $0x8] sm:$0xff]  ;;  %v1389_v22 = vld [vmem:[%s1931_s3 + $0xf8] sm:$0xff]  ;;  %v1378_v26 = vld [vmem:[%s1931_s3 + $0xa0] sm:$0xff] }
  0x32   :  { %518 = vmatpush.bf16.msrb.mxu3 %v1116_v23  ;;  %v1367_v19 = vld [vmem:[%s1931_s3 + $0x48] sm:$0xff]  ;;  %v1366_v23 = vld [vmem:[%s1931_s3 + $0x40] sm:$0xff]  ;;  %v1377_v28 = vld [vmem:[%s1931_s3 + $0x98] sm:$0xff] }
  0x33   :  { %v1387_v27 = vld [vmem:[%s1931_s3 + $0xe8] sm:$0xff]  ;;  %v1385_v32 = vld [vmem:[%s1931_s3 + $0xd8] sm:$0xff]  ;;  %v1384_v37 = vld [vmem:[%s1931_s3 + $0xd0] sm:$0xff] }
  0x34   :  { %480 = vmatpush.bf16.msrb.mxu0 %v968_v29  ;;  %v1386_v29 = vld [vmem:[%s1931_s3 + $0xe0] sm:$0xff]  ;;  %v1375_v33 = vld [vmem:[%s1931_s3 + $0x88] sm:$0xff] }
  0x35   :  { %493 = vmatpush.bf16.msrb.mxu1 %v1096_v30  ;;  %506 = vmatpush.bf16.msrb.mxu2 %v972_v31  ;;  %v1376_v30 = vld [vmem:[%s1931_s3 + $0x90] sm:$0xff]  ;;  %v543_v31 = vld [vmem:[%s1933_s2] sm:$0xf] }
  0x36   :  { %519 = vmatpush.bf16.msrb.mxu3 %v1100_v35  ;;  %v545_v35 = vperm.slane %v543_v31, 0  ;;  %v1374_v39 = vld [vmem:[%s1931_s3 + $0x80] sm:$0xff] }
  0x37   :  { %v1382_v52 = vld [vmem:[%s1931_s3 + $0xc0] sm:$0xff] }
  0x38   :  { %481 = vmatpush.bf16.msrb.mxu0 %v952_v41 }
  0x39   :  { %494 = vmatpush.bf16.msrb.mxu1 %v1080_v42  ;;  %507 = vmatpush.bf16.msrb.mxu2 %v956_v43  ;;  %v546_v42 = vperm.slane %v543_v31, 1  ;;  %v1383_v43 = vld [vmem:[%s1931_s3 + $0xc8] sm:$0xff] }
  0x3a   :  { %520 = vmatpush.bf16.msrb.mxu3 %v1084_v47 }
  0x3c   :  { %482 = vmatpush.bf16.msrb.mxu0 %v936_v54 }
  0x3d   :  { %495 = vmatpush.bf16.msrb.mxu1 %v1064_v55  ;;  %508 = vmatpush.bf16.msrb.mxu2 %v940_v57 }
  0x3e   :  { %521 = vmatpush.bf16.msrb.mxu3 %v1068_v61  ;;  %v547_v61 = vperm.slane %v543_v31, 2 }
  0x40   :  { %483 = vmatpush.bf16.msrb.mxu0 %v920_v3  ;;  %v548_v3 = vperm.slane %v543_v31, 3 }
  0x41   :  { %496 = vmatpush.bf16.msrb.mxu1 %v1048_v4  ;;  %509 = vmatpush.bf16.msrb.mxu2 %v924_v5 }
  0x42   :  { %522 = vmatpush.bf16.msrb.mxu3 %v1052_v6 }
  0x43   :  { %484 = vmatmul.bf16.vlgmr.msrb.gmra.mxu0 %v1662_v53 }
  0x44   :  { %833 = vmatpush.bf16.msra.mxu0 %v1365_v7  ;;  %497 = vmatmul.bf16.vlgmr.msrb.gmra.mxu1 %v1670_v56 }
  0x45   :  { %846 = vmatpush.bf16.msra.mxu1 %v1373_v8  ;;  %510 = vmatmul.bf16.vlgmr.msrb.gmra.mxu2 %v1662_v53  ;;  %v1370_v53 = vld [vmem:[%s1931_s3 + $0x60] sm:$0xff] }
  0x46   :  { %523 = vmatmul.bf16.vlgmr.msrb.gmra.mxu3 %v1670_v56  ;;  %v1361_v56 = vld [vmem:[%s1931_s3 + $0x18] sm:$0xff]  ;;  %859 = vmatpush.bf16.msra.mxu2 %v1381_v17 }
  0x47   :  { %872 = vmatpush.bf16.msra.mxu3 %v1389_v22 }
  0x48   :  { %834 = vmatpush.bf16.msra.mxu0 %v1364_v9 }
  0x49   :  { %847 = vmatpush.bf16.msra.mxu1 %v1372_v10 }
  0x4a   :  { %860 = vmatpush.bf16.msra.mxu2 %v1380_v20 }
  0x4b   :  { %873 = vmatpush.bf16.msra.mxu3 %v1388_v25 }
  0x4c   :  { %835 = vmatpush.bf16.msra.mxu0 %v1363_v11 }
  0x4d   :  { %848 = vmatpush.bf16.msra.mxu1 %v1371_v12 }
  0x4e   :  { %861 = vmatpush.bf16.msra.mxu2 %v1379_v24 }
  0x4f   :  { %874 = vmatpush.bf16.msra.mxu3 %v1387_v27 }
  0x50   :  { %836 = vmatpush.bf16.msra.mxu0 %v1362_v13 }
  0x51   :  { %849 = vmatpush.bf16.msra.mxu1 %v1370_v53 }
  0x52   :  { %862 = vmatpush.bf16.msra.mxu2 %v1378_v26 }
  0x53   :  { %875 = vmatpush.bf16.msra.mxu3 %v1386_v29 }
  0x54   :  { %837 = vmatpush.bf16.msra.mxu0 %v1361_v56 }
  0x55   :  { %850 = vmatpush.bf16.msra.mxu1 %v1369_v14 }
  0x56   :  { %863 = vmatpush.bf16.msra.mxu2 %v1377_v28 }
  0x57   :  { %876 = vmatpush.bf16.msra.mxu3 %v1385_v32 }
  0x58   :  { %838 = vmatpush.bf16.msra.mxu0 %v1360_v15 }
  0x59   :  { %851 = vmatpush.bf16.msra.mxu1 %v1368_v16 }
  0x5a   :  { %864 = vmatpush.bf16.msra.mxu2 %v1376_v30 }
  0x5b   :  { %877 = vmatpush.bf16.msra.mxu3 %v1384_v37 }
  0x5c   :  { %839 = vmatpush.bf16.msra.mxu0 %v1359_v18  ;;  %v1390_v18 = vld [vmem:[%s1932_s4] ss:$0 sm:$0xff] }
  0x5d   :  { %852 = vmatpush.bf16.msra.mxu1 %v1367_v19 }
  0x5e   :  { %865 = vmatpush.bf16.msra.mxu2 %v1375_v33 }
  0x5f   :  { %878 = vmatpush.bf16.msra.mxu3 %v1383_v43 }
  0x60   :  { %840 = vmatpush.bf16.msra.mxu0 %v1358_v21 }
  0x61   :  { %853 = vmatpush.bf16.msra.mxu1 %v1366_v23 }
  0x62   :  { %866 = vmatpush.bf16.msra.mxu2 %v1374_v39 }
  0x63   :  { %879 = vmatpush.bf16.msra.mxu3 %v1382_v52 }
  0xa0   :  { %v433_v34 = vpop.f32.mrf.mxu0 }
  0xa3   :  { %v446_v36 = vpop.f32.mrf.mxu1 }
  0xa4   :  { %v447_v38 = vadd.f32 %v446_v36, %v433_v34 }
  0xa6   :  { %v553_v40 = vadd.f32 %v545_v35, %v447_v38 }
  0xa7   :  { %v459_v41 = vpop.f32.mrf.mxu2 }
  0xa8   :  { %vm557_vm0 = vcmp.gt.f32.partialorder %v553_v40, 0.0  ;;  %v561_v44 = vmul.f32 0.2, %v553_v40  ;;  %v435_v48 = vpop.f32.mrf.mxu0 }
  0xaa   :  { %v472_v45 = vpop.f32.mrf.mxu3  ;;  %v565_v47 = vsel %vm557_vm0, %v553_v40, %v561_v44 }
  0xab   :  { %v473_v46 = vadd.f32 %v472_v45, %v459_v41  ;;  %v569_v49 = vpack.c.bf16 %v565_v47, %v565_v47  ;;  %v448_v51 = vpop.f32.mrf.mxu1 }
  0xad   :  { %v554_v50 = vadd.f32 %v546_v42, %v473_v46  ;;  %841 = vmatmul.bf16.vlgmr.msra.gmra.mxu0 %v569_v49 }
  0xaf   :  { %vm558_vm1 = vcmp.gt.f32.partialorder %v554_v50, 0.0  ;;  %v562_v54 = vmul.f32 0.2, %v554_v50  ;;  %v461_v57 = vpop.f32.mrf.mxu2 }
  0xb1   :  { %v566_v55 = vsel %vm558_vm1, %v554_v50, %v562_v54 }
  0xb2   :  { %v570_v58 = vpack.c.bf16 %v566_v55, %v566_v55  ;;  %v474_v59 = vpop.f32.mrf.mxu3 }
  0xb4   :  { %854 = vmatmul.bf16.vlgmr.msra.gmra.mxu1 %v570_v58 }
  0xc0   :  { %v485_v60 = vpop.f32.mrf.mxu0 }
  0xc1   :  { %v498_v62 = vpop.f32.mrf.mxu1 }
  0xc2   :  { %v499_v63 = vadd.f32 %v498_v62, %v485_v60 }
  0xc4   :  { %v555_v0 = vadd.f32 %v547_v61, %v499_v63 }
  0xc6   :  { %vm559_vm2 = vcmp.gt.f32.partialorder %v555_v0, 0.0  ;;  %v563_v1 = vmul.f32 0.2, %v555_v0 }
  0xc8   :  { %v511_v2 = vpop.f32.mrf.mxu2  ;;  %v567_v4 = vsel %vm559_vm2, %v555_v0, %v563_v1  ;;  %v487_v6 = vpop.f32.mrf.mxu0 }
  0xc9   :  { %v524_v5 = vpop.f32.mrf.mxu3  ;;  %v571_v7 = vpack.c.bf16 %v567_v4, %v567_v4  ;;  %v500_v9 = vpop.f32.mrf.mxu1 }
  0xca   :  { %v525_v8 = vadd.f32 %v524_v5, %v511_v2 }
  0xcb   :  { %867 = vmatmul.bf16.vlgmr.msra.gmra.mxu2 %v571_v7 }
  0xcc   :  { %v556_v10 = vadd.f32 %v548_v3, %v525_v8 }
  0xce   :  { %vm560_vm3 = vcmp.gt.f32.partialorder %v556_v10, 0.0  ;;  %v564_v11 = vmul.f32 0.2, %v556_v10 }
  0xd0   :  { %v568_v12 = vsel %vm560_vm3, %v556_v10, %v564_v11  ;;  %v513_v13 = vpop.f32.mrf.mxu2 }
  0xd1   :  { %v572_v53 = vpack.c.bf16 %v568_v12, %v568_v12  ;;  %v526_v56 = vpop.f32.mrf.mxu3 }
  0xd3   :  { %880 = vmatmul.bf16.vlgmr.msra.gmra.mxu3 %v572_v53 }
 0x12a   :  { %v842_v14 = vpop.f32.mrf.mxu0 }
 0x12b   :  { %v843_v19 = vadd.f32 %v1390_v18, %v842_v14 }
 0x131   :  { %v855_v15 = vpop.f32.mrf.mxu1 }
 0x132   :  { %v844_v16 = vpop.f32.mrf.mxu0  ;;  %v856_v21 = vadd.f32 %v855_v15, %v843_v19 }
 0x139   :  { %v857_v17 = vpop.f32.mrf.mxu1 }
 0x14e   :  { %v868_v20 = vpop.f32.mrf.mxu2 }
 0x14f   :  { %v869_v22 = vadd.f32 %v868_v20, %v856_v21 }
 0x156   :  { %v881_v23 = vpop.f32.mrf.mxu3  ;;  %v870_v25 = vpop.f32.mrf.mxu2 }
 0x157   :  { %v882_v24 = vadd.f32 %v881_v23, %v869_v22 }
 0x159   :  { %v1293_v26 = vmul.f32 -1.442695, %v882_v24 }
 0x15b   :  { %1391 = vpow2.f32 %v1293_v26 }
 0x15e   :  { %v883_v27 = vpop.f32.mrf.mxu3 }
 0x161   :  { %v1392_v28 = vpop.eup %1391 }
 0x162   :  { %v888_v29 = vadd.f32 1.0, %v1392_v28 }
 0x164   :  { %1393 = vrcp.f32 %v888_v29  ;;  %v900_v33 = vand.u32 2147483648, %v888_v29  ;;  %v898_v35 = vand.u32 2147483647, %v888_v29  ;;  %vm894_vm5 = vweird.f32 %v888_v29 }
 0x166   :  { %v901_v37 = vor.u32 1.1754944e-38, %v900_v33  ;;  %vm899_vm7 = vcmp.eq.f32.partialorder %v898_v35, 8.507059e+37 }
 0x16a   :  { %v1394_v30 = vpop.eup %1393 }
 0x16b   :  { %v890_v31 = vmul.f32 %v1394_v30, %v888_v29  ;;  %vm895_vm4 = vweird.f32 %v1394_v30 }
 0x16c   :  { %vm896_vm6 = vmor %vm894_vm5, %vm895_vm4 }
 0x16d   :  { %v891_v32 = vsub.f32 1.0, %v890_v31 }
 0x16f   :  { %v892_v34 = vmul.f32 %v1394_v30, %v891_v32 }
 0x171   :  { %v893_v36 = vadd.f32 %v1394_v30, %v892_v34 }
 0x173   :  { %v897_v38 = vsel %vm896_vm6, %v1394_v30, %v893_v36 }
 0x174   :  { %v902_v39 = vsel %vm899_vm7, %v901_v37, %v897_v38 }
 0x175   :  { %904 = vst [vmem:[%s1934_s5] sm:$0xff] %v902_v39 }

</bundles_post_ra>
